<compile_context>
chip_gen: v5e
topology: v5e:2x2
jax: 0.10.0
libtpu: 0.0.40
codegen_flags: <defaults>
</compile_context>

<pallas_src>
import jax
import jax.numpy as jnp
from jax.experimental import pallas as pl
from jax.experimental.pallas import tpu as pltpu


def bpnet_kernel(x_ref,
                 w1_ref, b1_ref,
                 w2_ref, b2_ref,
                 w3_ref, b3_ref,
                 w4_ref, b4_ref,
                 o_ref):
    cd = w1_ref.dtype                                   # compute dtype (bf16)
    x = x_ref[...].astype(cd)                           # (tb, D_in)

    # fc1 (+ folded bn1) -> relu
    h1 = jnp.dot(x, w1_ref[...], preferred_element_type=jnp.float32) + b1_ref[...]
    h1 = jnp.maximum(h1, 0.0)                           # (tb, 256) f32

    # dropout(0.3) -> identity in eval mode

    # fc2 (+ folded bn2) -> relu, plus residual h1[:, :128] (128-lane aligned)
    h2 = jnp.dot(h1.astype(cd), w2_ref[...], preferred_element_type=jnp.float32) + b2_ref[...]
    h2 = jnp.maximum(h2, 0.0) + h1[:, :128]             # (tb, 128) f32

    # fc3 -> relu  (output lane-padded 64 -> 128; pad columns stay zero)
    h3 = jnp.dot(h2.astype(cd), w3_ref[...], preferred_element_type=jnp.float32) + b3_ref[...]
    h3 = jnp.maximum(h3, 0.0)                           # (tb, 128) f32

    # fc4 (logits), padded to 8 output columns (cols 4..7 are zero)
    o_ref[...] = (jnp.dot(h3.astype(cd), w4_ref[...],
                          preferred_element_type=jnp.float32) + b4_ref[...]
                  ).astype(o_ref.dtype)                 # (tb, 8)


def _round_up(v, m):
    return -(-v // m) * m


def bpnet_forward(x, params, *, batch_tile=None):
    """x: (B, D_in) float32 (or bf16). params: dict from init_params.
    Returns (B, 4) float32 logits."""
    B, D_in = x.shape

    if batch_tile is None:
        b8 = _round_up(B, 8)
        if b8 < 512:
            # tiny batch: single tile, minimal padding
            batch_tile = b8
        else:
            # 256..1024-row tiles, and >= 2 grid steps so both v7x
            # TensorCores get work via dimension_semantics=("parallel",)
            batch_tile = min(1024, _round_up(b8 // 2, 256))
    tb = batch_tile
    assert tb % 8 == 0, "batch tile must be a multiple of 8 (f32 sublanes)"

    # Pad batch so the grid divides evenly; slice back below.
    Bp = _round_up(B, tb)
    if Bp != B:
        x = jnp.pad(x, ((0, Bp - B), (0, 0)))

    w1, b1 = params["w1"], params["b1"]
    w2, b2 = params["w2"], params["b2"]
    w3, b3 = params["w3"], params["b3"]
    w4, b4 = params["w4"], params["b4"]
    n_out_padded = w4.shape[1]                          # 8 (>= 4 logits)

    def full(arr):
        # whole array resident in VMEM; constant index -> DMA'd once
        return pl.BlockSpec(arr.shape, lambda i: (0,) * arr.ndim)

    grid = (Bp // tb,)
    out = pl.pallas_call(
        bpnet_kernel,
        out_shape=jax.ShapeDtypeStruct((Bp, n_out_padded), jnp.float32),
        grid_spec=pltpu.PrefetchScalarGridSpec(
            num_scalar_prefetch=0,
            grid=grid,
            in_specs=[
                pl.BlockSpec((tb, D_in), lambda i: (i, 0)),   # x (batch-tiled)
                full(w1), full(b1),
                full(w2), full(b2),
                full(w3), full(b3),
                full(w4), full(b4),
            ],
            out_specs=pl.BlockSpec((tb, n_out_padded), lambda i: (i, 0)),
        ),
        compiler_params=pltpu.CompilerParams(
            dimension_semantics=("parallel",)),
    )(x, w1, b1, w2, b2, w3, b3, w4, b4)

    return out[:B, :4]


def init_params(key, input_size, *, compute_dtype=jnp.bfloat16):
    """nn.Linear-default init (U[-1/sqrt(fan_in), +]) with nn.BatchNorm1d
    eval-mode defaults (gamma=1, beta=0, running mean 0 / var 1) folded
    directly into the fc1/fc2 weights and biases.

    Padding for the kernel:
      * fc3: 64 -> 128 output columns (zeros) so h3 is lane-dense.
      * fc4: rows 64 -> 128 (zeros, matching h3's pad), cols 4 -> 8 so the
        kernel output block is (tb, 8) and the writeback stream is small.
    Weights are stored in `compute_dtype` (bf16 for the MXU); biases stay f32."""
    dims = [(input_size, 256), (256, 128), (128, 64), (64, 4)]
    raw = {}
    for idx, (fan_in, fan_out) in enumerate(dims, start=1):
        key, kw, kb = jax.random.split(key, 3)
        bound = 1.0 / (fan_in ** 0.5)
        raw[f"w{idx}"] = jax.random.uniform(
            kw, (fan_in, fan_out), jnp.float32, -bound, bound)
        raw[f"b{idx}"] = jax.random.uniform(
            kb, (1, fan_out), jnp.float32, -bound, bound)

    eps = 1e-5

    def bn_fold(w, b, nfeat):
        gamma = jnp.ones((1, nfeat), jnp.float32)
        beta = jnp.zeros((1, nfeat), jnp.float32)
        running_mean = jnp.zeros((1, nfeat), jnp.float32)
        running_var = jnp.ones((1, nfeat), jnp.float32)
        scale = gamma / jnp.sqrt(running_var + eps)
        shift = beta - running_mean * scale
        return w * scale, b * scale + shift

    w1, b1 = bn_fold(raw["w1"], raw["b1"], 256)
    w2, b2 = bn_fold(raw["w2"], raw["b2"], 128)
    # fc3: lane-pad outputs 64 -> 128 with zeros.
    w3 = jnp.pad(raw["w3"], ((0, 0), (0, 128 - 64)))
    b3 = jnp.pad(raw["b3"], ((0, 0), (0, 128 - 64)))
    # fc4: pad rows 64 -> 128 (to match padded h3) and cols 4 -> 8.
    w4 = jnp.pad(raw["w4"], ((0, 128 - 64), (0, 8 - 4)))
    b4 = jnp.pad(raw["b4"], ((0, 0), (0, 8 - 4)))

    return {
        "w1": w1.astype(compute_dtype), "b1": b1,
        "w2": w2.astype(compute_dtype), "b2": b2,
        "w3": w3.astype(compute_dtype), "b3": b3,
        "w4": w4.astype(compute_dtype), "b4": b4,
    }


def bpnet_reference(x, p):
    """Pure-JAX reference with the same bf16-at-the-dot / f32-accumulate math."""
    cd = p["w1"].dtype
    h1 = jnp.maximum(
        jnp.dot(x.astype(cd), p["w1"], preferred_element_type=jnp.float32) + p["b1"], 0.0)
    h2 = jnp.maximum(
        jnp.dot(h1.astype(cd), p["w2"], preferred_element_type=jnp.float32) + p["b2"], 0.0
    ) + h1[:, :128]
    h3 = jnp.maximum(
        jnp.dot(h2.astype(cd), p["w3"], preferred_element_type=jnp.float32) + p["b3"], 0.0)
    out = jnp.dot(h3.astype(cd), p["w4"], preferred_element_type=jnp.float32) + p["b4"]
    return out[:, :4]


if __name__ == "__main__":
    key = jax.random.PRNGKey(0)
    key, kx, kp = jax.random.split(key, 3)

    B, INPUT_SIZE = 512, 32          # 512 rows -> tb=256 -> 2 parallel grid steps
    x = jax.random.normal(kx, (B, INPUT_SIZE), jnp.float32)
    params = init_params(kp, INPUT_SIZE)

    out = bpnet_forward(x, params)
    out = jax.block_until_ready(out)

    ref = bpnet_reference(x, params)
    assert out.shape == (B, 4), out.shape
    assert jnp.allclose(out, ref, atol=1e-3, rtol=1e-3), (
        float(jnp.max(jnp.abs(out - ref))))

    print("KERNEL_OK")
</pallas_src>

<mosaic_0001>
module attributes {stable_mosaic.version = 11 : i64} {
  func.func @bpnet_kernel(%arg0: i32, %arg1: memref<256x32xf32, #tpu.memory_space<vmem>>, %arg2: memref<32x256xbf16, #tpu.memory_space<vmem>>, %arg3: memref<1x256xf32, #tpu.memory_space<vmem>>, %arg4: memref<256x128xbf16, #tpu.memory_space<vmem>>, %arg5: memref<1x128xf32, #tpu.memory_space<vmem>>, %arg6: memref<128x128xbf16, #tpu.memory_space<vmem>>, %arg7: memref<1x128xf32, #tpu.memory_space<vmem>>, %arg8: memref<128x8xbf16, #tpu.memory_space<vmem>>, %arg9: memref<1x8xf32, #tpu.memory_space<vmem>>, %arg10: memref<256x8xf32, #tpu.memory_space<vmem>>) attributes {dimension_semantics = [#tpu.dimension_semantics<parallel>], iteration_bounds = array<i64: 2>, scalar_prefetch = 0 : i64, scratch_operands = 0 : i64, tpu.core_type = #tpu.core_type<tc>, window_params = [{transform_indices = @transform_0, window_bounds = array<i64: 256, 32>}, {pipeline_mode = #tpu.pipeline_mode<synchronous>, transform_indices = @transform_1, window_bounds = array<i64: 32, 256>}, {pipeline_mode = #tpu.pipeline_mode<synchronous>, transform_indices = @transform_2, window_bounds = array<i64: 1, 256>}, {pipeline_mode = #tpu.pipeline_mode<synchronous>, transform_indices = @transform_3, window_bounds = array<i64: 256, 128>}, {pipeline_mode = #tpu.pipeline_mode<synchronous>, transform_indices = @transform_4, window_bounds = array<i64: 1, 128>}, {pipeline_mode = #tpu.pipeline_mode<synchronous>, transform_indices = @transform_5, window_bounds = array<i64: 128, 128>}, {pipeline_mode = #tpu.pipeline_mode<synchronous>, transform_indices = @transform_6, window_bounds = array<i64: 1, 128>}, {pipeline_mode = #tpu.pipeline_mode<synchronous>, transform_indices = @transform_7, window_bounds = array<i64: 128, 8>}, {pipeline_mode = #tpu.pipeline_mode<synchronous>, transform_indices = @transform_8, window_bounds = array<i64: 1, 8>}, {transform_indices = @transform_9, window_bounds = array<i64: 256, 8>}]} {
    %c0 = arith.constant 0 : index
    %c0_0 = arith.constant 0 : index
    %0 = vector.load %arg1[%c0, %c0_0] : memref<256x32xf32, #tpu.memory_space<vmem>>, vector<256x32xf32>
    %1 = arith.truncf %0 : vector<256x32xf32> to vector<256x32xbf16>
    %c0_1 = arith.constant 0 : index
    %c0_2 = arith.constant 0 : index
    %2 = vector.load %arg2[%c0_1, %c0_2] : memref<32x256xbf16, #tpu.memory_space<vmem>>, vector<32x256xbf16>
    %cst = arith.constant dense<0.000000e+00> : vector<256x256xf32>
    %3 = tpu.matmul %1, %2, %cst {dimension_numbers = #tpu.dot_dimension_numbers<[1], [0], [0], [1], [0, 0, 1, 1], [], []>} : vector<256x32xbf16>, vector<32x256xbf16>, vector<256x256xf32> -> vector<256x256xf32>
    %c0_3 = arith.constant 0 : index
    %c0_4 = arith.constant 0 : index
    %4 = vector.load %arg3[%c0_3, %c0_4] : memref<1x256xf32, #tpu.memory_space<vmem>>, vector<1x256xf32>
    %5 = vector.broadcast %4 : vector<1x256xf32> to vector<256x256xf32>
    %6 = arith.addf %3, %5 : vector<256x256xf32>
    %cst_5 = arith.constant 0.000000e+00 : f32
    %7 = vector.broadcast %cst_5 : f32 to vector<256x256xf32>
    %8 = arith.maximumf %6, %7 : vector<256x256xf32>
    %9 = arith.truncf %8 : vector<256x256xf32> to vector<256x256xbf16>
    %c0_6 = arith.constant 0 : index
    %c0_7 = arith.constant 0 : index
    %10 = vector.load %arg4[%c0_6, %c0_7] : memref<256x128xbf16, #tpu.memory_space<vmem>>, vector<256x128xbf16>
    %cst_8 = arith.constant dense<0.000000e+00> : vector<256x128xf32>
    %11 = tpu.matmul %9, %10, %cst_8 {dimension_numbers = #tpu.dot_dimension_numbers<[1], [0], [0], [1], [0, 0, 1, 1], [], []>} : vector<256x256xbf16>, vector<256x128xbf16>, vector<256x128xf32> -> vector<256x128xf32>
    %c0_9 = arith.constant 0 : index
    %c0_10 = arith.constant 0 : index
    %12 = vector.load %arg5[%c0_9, %c0_10] : memref<1x128xf32, #tpu.memory_space<vmem>>, vector<1x128xf32>
    %13 = vector.broadcast %12 : vector<1x128xf32> to vector<256x128xf32>
    %14 = arith.addf %11, %13 : vector<256x128xf32>
    %cst_11 = arith.constant 0.000000e+00 : f32
    %15 = vector.broadcast %cst_11 : f32 to vector<256x128xf32>
    %16 = arith.maximumf %14, %15 : vector<256x128xf32>
    %17 = vector.extract_strided_slice %8 {offsets = [0, 0], sizes = [256, 128], strides = [1, 1]} : vector<256x256xf32> to vector<256x128xf32>
    %18 = arith.addf %16, %17 : vector<256x128xf32>
    %19 = arith.truncf %18 : vector<256x128xf32> to vector<256x128xbf16>
    %c0_12 = arith.constant 0 : index
    %c0_13 = arith.constant 0 : index
    %20 = vector.load %arg6[%c0_12, %c0_13] : memref<128x128xbf16, #tpu.memory_space<vmem>>, vector<128x128xbf16>
    %cst_14 = arith.constant dense<0.000000e+00> : vector<256x128xf32>
    %21 = tpu.matmul %19, %20, %cst_14 {dimension_numbers = #tpu.dot_dimension_numbers<[1], [0], [0], [1], [0, 0, 1, 1], [], []>} : vector<256x128xbf16>, vector<128x128xbf16>, vector<256x128xf32> -> vector<256x128xf32>
    %c0_15 = arith.constant 0 : index
    %c0_16 = arith.constant 0 : index
    %22 = vector.load %arg7[%c0_15, %c0_16] : memref<1x128xf32, #tpu.memory_space<vmem>>, vector<1x128xf32>
    %23 = vector.broadcast %22 : vector<1x128xf32> to vector<256x128xf32>
    %24 = arith.addf %21, %23 : vector<256x128xf32>
    %cst_17 = arith.constant 0.000000e+00 : f32
    %25 = vector.broadcast %cst_17 : f32 to vector<256x128xf32>
    %26 = arith.maximumf %24, %25 : vector<256x128xf32>
    %27 = arith.truncf %26 : vector<256x128xf32> to vector<256x128xbf16>
    %c0_18 = arith.constant 0 : index
    %c0_19 = arith.constant 0 : index
    %28 = vector.load %arg8[%c0_18, %c0_19] : memref<128x8xbf16, #tpu.memory_space<vmem>>, vector<128x8xbf16>
    %cst_20 = arith.constant dense<0.000000e+00> : vector<256x8xf32>
    %29 = tpu.matmul %27, %28, %cst_20 {dimension_numbers = #tpu.dot_dimension_numbers<[1], [0], [0], [1], [0, 0, 1, 1], [], []>} : vector<256x128xbf16>, vector<128x8xbf16>, vector<256x8xf32> -> vector<256x8xf32>
    %c0_21 = arith.constant 0 : index
    %c0_22 = arith.constant 0 : index
    %30 = vector.load %arg9[%c0_21, %c0_22] : memref<1x8xf32, #tpu.memory_space<vmem>>, vector<1x8xf32>
    %31 = vector.broadcast %30 : vector<1x8xf32> to vector<256x8xf32>
    %32 = arith.addf %29, %31 : vector<256x8xf32>
    %c0_23 = arith.constant 0 : index
    %c0_24 = arith.constant 0 : index
    %33 = vector.load %arg10[%c0_23, %c0_24] : memref<256x8xf32, #tpu.memory_space<vmem>>, vector<256x8xf32>
    tpu.vector_store %arg10[%c0_23, %c0_24], %32 {strides = array<i32>} : memref<256x8xf32, #tpu.memory_space<vmem>>, vector<256x8xf32>,
    return
  }
  func.func @transform_0(%arg0: i32) -> (i32, i32) {
    %c0_i32 = arith.constant 0 : i32
    %c0_i32_0 = arith.constant 0 : i32
    return %arg0, %c0_i32 : i32, i32
  }
  func.func @transform_1(%arg0: i32) -> (i32, i32) {
    %c0_i32 = arith.constant 0 : i32
    %c0_i32_0 = arith.constant 0 : i32
    %c0_i32_1 = arith.constant 0 : i32
    return %c0_i32, %c0_i32_0 : i32, i32
  }
  func.func @transform_2(%arg0: i32) -> (i32, i32) {
    %c0_i32 = arith.constant 0 : i32
    %c0_i32_0 = arith.constant 0 : i32
    %c0_i32_1 = arith.constant 0 : i32
    return %c0_i32, %c0_i32_0 : i32, i32
  }
  func.func @transform_3(%arg0: i32) -> (i32, i32) {
    %c0_i32 = arith.constant 0 : i32
    %c0_i32_0 = arith.constant 0 : i32
    %c0_i32_1 = arith.constant 0 : i32
    return %c0_i32, %c0_i32_0 : i32, i32
  }
  func.func @transform_4(%arg0: i32) -> (i32, i32) {
    %c0_i32 = arith.constant 0 : i32
    %c0_i32_0 = arith.constant 0 : i32
    %c0_i32_1 = arith.constant 0 : i32
    return %c0_i32, %c0_i32_0 : i32, i32
  }
  func.func @transform_5(%arg0: i32) -> (i32, i32) {
    %c0_i32 = arith.constant 0 : i32
    %c0_i32_0 = arith.constant 0 : i32
    %c0_i32_1 = arith.constant 0 : i32
    return %c0_i32, %c0_i32_0 : i32, i32
  }
  func.func @transform_6(%arg0: i32) -> (i32, i32) {
    %c0_i32 = arith.constant 0 : i32
    %c0_i32_0 = arith.constant 0 : i32
    %c0_i32_1 = arith.constant 0 : i32
    return %c0_i32, %c0_i32_0 : i32, i32
  }
  func.func @transform_7(%arg0: i32) -> (i32, i32) {
    %c0_i32 = arith.constant 0 : i32
    %c0_i32_0 = arith.constant 0 : i32
    %c0_i32_1 = arith.constant 0 : i32
    return %c0_i32, %c0_i32_0 : i32, i32
  }
  func.func @transform_8(%arg0: i32) -> (i32, i32) {
    %c0_i32 = arith.constant 0 : i32
    %c0_i32_0 = arith.constant 0 : i32
    %c0_i32_1 = arith.constant 0 : i32
    return %c0_i32, %c0_i32_0 : i32, i32
  }
  func.func @transform_9(%arg0: i32) -> (i32, i32) {
    %c0_i32 = arith.constant 0 : i32
    %c0_i32_0 = arith.constant 0 : i32
    return %arg0, %c0_i32 : i32, i32
  }
}

</mosaic_0001>

<bundles_post_ra>
// kernel: tpu_custom_call.1
= control target key start
LH: loop header
LB: loop body
LE: loop exit
PB: predicated region body
PF: predicated region fallthrough
CT: control target
= control target key end

     0   :  { %s1883_s30 = smov 0   ;;  %s2635_s0 = inlined_call_operand.vmem [shape: f32[512,32], index: 0, kind: input, shape index: {}]   ;;  %s2636_s1 = inlined_call_operand.vmem [shape: bf16[32,256], index: 1, kind: input, shape index: {}]   ;;  %s2637_s2 = inlined_call_operand.vmem [shape: f32[1,256], index: 2, kind: input, shape index: {}]   ;;  %s2638_s3 = inlined_call_operand.vmem [shape: bf16[256,128], index: 3, kind: input, shape index: {}]   ;;  %s2639_s4 = inlined_call_operand.vmem [shape: f32[1,128], index: 4, kind: input, shape index: {}]   ;;  %s2640_s5 = inlined_call_operand.vmem [shape: bf16[128,128], index: 5, kind: input, shape index: {}]   ;;  %s2641_s6 = inlined_call_operand.vmem [shape: f32[1,128], index: 6, kind: input, shape index: {}]   ;;  %s2642_s7 = inlined_call_operand.vmem [shape: bf16[128,8], index: 7, kind: input, shape index: {}]   ;;  %s2643_s8 = inlined_call_operand.vmem [shape: f32[1,8], index: 8, kind: input, shape index: {}]   ;;  %s2644_s9 = inlined_call_operand.vmem [shape: f32[512,8], index: 9, kind: output, shape index: {}]  }
   0x1 LB: > { %s1579_s10 = sadd.s32 4294967295, %s1831_s30   ;;  %p1583_p0 = scmp.ge.s32.totalorder %s1831_s30, 1  ;;  %s1831_s30 = sphi %s1883_s30, %s19_s30  }
   0x2   : > { %p288_p1 = scmp.lt.s32.totalorder %s1831_s30, 3 }
   0x4   : > { %p289_p2 = pnand %p1583_p0, %p288_p1 }
   0x5   : > { %s1584_s27 = sshll.u32 (!%p289_p2), %s1579_s10, 5 }
   0x6   : > { %292 = sbr.rel (%p289_p2) target bundleno = 834 (0x342), region = 56  ;;  %p325_p3 = scmp.lt.s32.totalorder (!%p289_p2), %s1584_s27, 63 }
   0xb   : > { %v1598_v0 = vld [vmem:[%s2636_s1 + $0x10] sm:$0xf]  ;;  %v1769_v1 = vld [vmem:[%s2636_s1 + $0x14] sm:$0xf0]  ;;  %v1768_v2 = vld [vmem:[%s2636_s1 + $0x14] sm:$0xf] }
   0xc   : > { %v1599_v3 = vor.u32 %v1769_v1, %v1598_v0  ;;  %v1600_v4 = vld [vmem:[%s2636_s1 + $0x18] sm:$0xf0]  ;;  %v1590_v5 = vld [vmem:[%s2636_s1] sm:$0xf]  ;;  %v1767_v6 = vld [vmem:[%s2636_s1 + $0x4] sm:$0xf0] }
   0xd   : > { %v1603_v7 = vor.u32 %v1768_v2, %v1600_v4  ;;  %v1766_v8 = vld [vmem:[%s2636_s1 + $0x4] sm:$0xf]  ;;  %v1592_v9 = vld [vmem:[%s2636_s1 + $0x8] sm:$0xf0]  ;;  %v1591_v10 = vor.u32 %v1767_v6, %v1590_v5  ;;  %s2664_s27 = smov (!%p325_p3, %s1584_s27), 63  ;;  %v1785_v12 = vld [vmem:[%s2638_s3 + $0x78] sm:$0xff] }
   0xe   : > { %470 = vmatpush.bf16.msra.mxu0 %v1599_v3  ;;  %1802 = vmatpush.bf16.msra.mxu2 %v1599_v3  ;;  %v1595_v11 = vor.u32 %v1766_v8, %v1592_v9  ;;  %v1777_v13 = vld [vmem:[%s2638_s3 + $0x38] sm:$0xff]  ;;  %s1585_s10 = sshll.u32 %s2664_s27, 3  ;;  %vm415_vm0 = vcmask 261120   ;;  %v1784_v19 = vld [vmem:[%s2638_s3 + $0x70] sm:$0xff]  ;;  %v1783_v25 = vld [vmem:[%s2638_s3 + $0x68] sm:$0xff]  ;;  %vm1490_vm1 = vcmask 64512  }
   0xf   : > { %559 = vmatpush.bf16.msra.mxu1 %v1603_v7  ;;  %1804 = vmatpush.bf16.msra.mxu3 %v1603_v7  ;;  %s1929_s15 = scalar_lea.vmem %s2635_s0, %s1585_s10  ;;  %v1776_v24 = vld [vmem:[%s2638_s3 + $0x30] sm:$0xff]  ;;  %v1775_v32 = vld [vmem:[%s2638_s3 + $0x28] sm:$0xff]  ;;  %v1782_v33 = vld [vmem:[%s2638_s3 + $0x60] sm:$0xff]  ;;  %s2520_s14 = scalar_lea.vmem %s2644_s9, %s1585_s10 }
  0x10   : > { %v337_v14 = vld [vmem:[%s1929_s15] sm:$0xff]  ;;  %v338_v15 = vld [vmem:[%s1929_s15 + $0x8] sm:$0xff]  ;;  %v355_v21 = vld [vmem:[%s1929_s15 + $0x90] sm:$0xff] }
  0x11   : > { %v353_v16 = vld [vmem:[%s1929_s15 + $0x80] sm:$0xff]  ;;  %v369_v17 = vpack.c.bf16 %v338_v15, %v337_v14  ;;  %v354_v18 = vld [vmem:[%s1929_s15 + $0x88] sm:$0xff]  ;;  %v356_v22 = vld [vmem:[%s1929_s15 + $0x98] sm:$0xff] }
  0x12   : > { %471 = vmatpush.bf16.msra.mxu0 %v1591_v10  ;;  %1803 = vmatpush.bf16.msra.mxu2 %v1591_v10  ;;  %v1938_v20 = vpack.c.bf16 %v354_v18, %v353_v16  ;;  %v378_v23 = vpack.c.bf16 %v356_v22, %v355_v21  ;;  %v339_v26 = vld [vmem:[%s1929_s15 + $0x10] sm:$0xff]  ;;  %v340_v27 = vld [vmem:[%s1929_s15 + $0x18] sm:$0xff]  ;;  %v357_v28 = vld [vmem:[%s1929_s15 + $0xa0] sm:$0xff] }
  0x13   : > { %560 = vmatpush.bf16.msra.mxu1 %v1595_v11  ;;  %1805 = vmatpush.bf16.msra.mxu3 %v1595_v11  ;;  %v358_v29 = vld [vmem:[%s1929_s15 + $0xa8] sm:$0xff]  ;;  %v370_v30 = vpack.c.bf16 %v340_v27, %v339_v26  ;;  %v341_v34 = vld [vmem:[%s1929_s15 + $0x20] sm:$0xff]  ;;  %v359_v36 = vld [vmem:[%s1929_s15 + $0xb0] sm:$0xff] }
  0x14   : > { %v379_v31 = vpack.c.bf16 %v358_v29, %v357_v28  ;;  %v342_v35 = vld [vmem:[%s1929_s15 + $0x28] sm:$0xff]  ;;  %v360_v37 = vld [vmem:[%s1929_s15 + $0xb8] sm:$0xff]  ;;  %v1774_v40 = vld [vmem:[%s2638_s3 + $0x20] sm:$0xff] }
  0x15   : > { %1604 = vmatmul.msk.bf16.vlgmr.msra.gmra.mxu0 %vm415_vm0, %v369_v17  ;;  %1613 = vmatmul.msk.bf16.vlgmr.msra.gmra.mxu2 %vm415_vm0, %v378_v23  ;;  %v371_v38 = vpack.c.bf16 %v342_v35, %v341_v34  ;;  %v380_v39 = vpack.c.bf16 %v360_v37, %v359_v36  ;;  %v1781_v41 = vld [vmem:[%s2638_s3 + $0x58] sm:$0xff]  ;;  %v343_v42 = vld [vmem:[%s1929_s15 + $0x30] sm:$0xff]  ;;  %v361_v44 = vld [vmem:[%s1929_s15 + $0xc0] sm:$0xff] }
  0x16   : > { %870 = vmatpush.bf16.msrb.mxu2 %v1777_v13  ;;  %1620 = vmatmul.msk.bf16.vlgmr.msra.gmra.mxu1 %vm415_vm0, %v369_v17  ;;  %v344_v43 = vld [vmem:[%s1929_s15 + $0x38] sm:$0xff]  ;;  %v362_v45 = vld [vmem:[%s1929_s15 + $0xc8] sm:$0xff]  ;;  %v1780_v49 = vld [vmem:[%s2638_s3 + $0x50] sm:$0xff] }
  0x17   : > { %959 = vmatpush.bf16.msrb.mxu3 %v1785_v12  ;;  %v372_v46 = vpack.c.bf16 %v344_v43, %v343_v42  ;;  %v381_v47 = vpack.c.bf16 %v362_v45, %v361_v44  ;;  %v1773_v48 = vld [vmem:[%s2638_s3 + $0x18] sm:$0xff]  ;;  %v345_v50 = vld [vmem:[%s1929_s15 + $0x40] sm:$0xff]  ;;  %v346_v51 = vld [vmem:[%s1929_s15 + $0x48] sm:$0xff] }
  0x18   : > { %1628 = vmatmul.msk.bf16.vlgmr.msra.gmra.mxu3 %vm415_vm0, %v1938_v20  ;;  %v363_v52 = vld [vmem:[%s1929_s15 + $0xd0] sm:$0xff]  ;;  %v364_v53 = vld [vmem:[%s1929_s15 + $0xd8] sm:$0xff]  ;;  %v373_v54 = vpack.c.bf16 %v346_v51, %v345_v50  ;;  %v1779_v57 = vld [vmem:[%s2638_s3 + $0x48] sm:$0xff] }
  0x19   : > { %v382_v55 = vpack.c.bf16 %v364_v53, %v363_v52  ;;  %v1772_v56 = vld [vmem:[%s2638_s3 + $0x10] sm:$0xff]  ;;  %v348_v59 = vld [vmem:[%s1929_s15 + $0x58] sm:$0xff]  ;;  %v365_v60 = vld [vmem:[%s1929_s15 + $0xe0] sm:$0xff] }
  0x1a   : > { %871 = vmatpush.bf16.msrb.mxu2 %v1776_v24  ;;  %v347_v58 = vld [vmem:[%s1929_s15 + $0x50] sm:$0xff]  ;;  %v366_v61 = vld [vmem:[%s1929_s15 + $0xe8] sm:$0xff]  ;;  %v349_v1 = vld [vmem:[%s1929_s15 + $0x60] sm:$0xff] }
  0x1b   : > { %960 = vmatpush.bf16.msrb.mxu3 %v1784_v19  ;;  %v374_v62 = vpack.c.bf16 %v348_v59, %v347_v58  ;;  %v383_v63 = vpack.c.bf16 %v366_v61, %v365_v60  ;;  %v1771_v0 = vld [vmem:[%s2638_s3 + $0x8] sm:$0xff]  ;;  %v367_v3 = vld [vmem:[%s1929_s15 + $0xf0] sm:$0xff]  ;;  %v368_v4 = vld [vmem:[%s1929_s15 + $0xf8] sm:$0xff] }
  0x1c   : > { %v350_v2 = vld [vmem:[%s1929_s15 + $0x68] sm:$0xff]  ;;  %v384_v6 = vpack.c.bf16 %v368_v4, %v367_v3  ;;  %v1770_v7 = vld [vmem:[%s2638_s3] sm:$0xff]  ;;  %v351_v9 = vld [vmem:[%s1929_s15 + $0x70] sm:$0xff] }
  0x1d   : > { %v375_v5 = vpack.c.bf16 %v350_v2, %v349_v1  ;;  %v1778_v8 = vld [vmem:[%s2638_s3 + $0x40] sm:$0xff]  ;;  %v352_v10 = vld [vmem:[%s1929_s15 + $0x78] sm:$0xff]  ;;  %v1791_v58 = vld [vmem:[%s2640_s5 + $0x28] sm:$0xff] }
  0x1e   : > { %872 = vmatpush.bf16.msrb.mxu2 %v1775_v32  ;;  %v376_v11 = vpack.c.bf16 %v352_v10, %v351_v9  ;;  %v1793_v12 = vld [vmem:[%s2640_s5 + $0x38] sm:$0xff]  ;;  %v389_v13 = vld [vmem:[%s2637_s2] sm:$0x3] }
  0x1f   : > { %961 = vmatpush.bf16.msrb.mxu3 %v1783_v25  ;;  %1196 = vmatpush.bf16.msrb.mxu0 %v1793_v12  ;;  %v2045_v16 = vperm.slane %v389_v13, 0  ;;  %v2047_v17 = vperm.slane %v389_v13, 1 }
  0x22   : > { %873 = vmatpush.bf16.msrb.mxu2 %v1774_v40 }
  0x23   : > { %962 = vmatpush.bf16.msrb.mxu3 %v1782_v33 }
  0x25   : > { %1605 = vmatmul.msk.bf16.gmra.mxu0 %vm415_vm0, %v370_v30  ;;  %1614 = vmatmul.msk.bf16.gmra.mxu2 %vm415_vm0, %v379_v31 }
  0x26   : > { %1621 = vmatmul.msk.bf16.gmra.mxu1 %vm415_vm0, %v370_v30  ;;  %874 = vmatpush.bf16.msrb.mxu2 %v1773_v48  ;;  %v1792_v30 = vld [vmem:[%s2640_s5 + $0x30] sm:$0xff] }
  0x27   : > { %963 = vmatpush.bf16.msrb.mxu3 %v1781_v41  ;;  %1197 = vmatpush.bf16.msrb.mxu0 %v1792_v30 }
  0x28   : > { %1629 = vmatmul.msk.bf16.gmra.mxu3 %vm415_vm0, %v378_v23 }
  0x2a   : > { %875 = vmatpush.bf16.msrb.mxu2 %v1772_v56 }
  0x2b   : > { %964 = vmatpush.bf16.msrb.mxu3 %v1780_v49  ;;  %1198 = vmatpush.bf16.msrb.mxu0 %v1791_v58 }
  0x2e   : > { %876 = vmatpush.bf16.msrb.mxu2 %v1771_v0 }
  0x2f   : > { %965 = vmatpush.bf16.msrb.mxu3 %v1779_v57 }
  0x32   : > { %877 = vmatpush.bf16.msrb.mxu2 %v1770_v7 }
  0x33   : > { %966 = vmatpush.bf16.msrb.mxu3 %v1778_v8 }
  0x35   : > { %1606 = vmatmul.msk.bf16.gmra.mxu0 %vm415_vm0, %v371_v38  ;;  %1615 = vmatmul.msk.bf16.gmra.mxu2 %vm415_vm0, %v380_v39 }
  0x36   : > { %1622 = vmatmul.msk.bf16.gmra.mxu1 %vm415_vm0, %v371_v38  ;;  %1806 = vmatpush.bf16.msra.mxu2 %v1793_v12 }
  0x38   : > { %1630 = vmatmul.msk.bf16.gmra.mxu3 %vm415_vm0, %v379_v31 }
  0x3a   : > { %1807 = vmatpush.bf16.msra.mxu2 %v1792_v30  ;;  %v1790_v30 = vld [vmem:[%s2640_s5 + $0x20] sm:$0xff] }
  0x3b   : > { %1199 = vmatpush.bf16.msrb.mxu0 %v1790_v30 }
  0x3e   : > { %1808 = vmatpush.bf16.msra.mxu2 %v1791_v58 }
  0x42   : > { %1809 = vmatpush.bf16.msra.mxu2 %v1790_v30 }
  0x45   : > { %1607 = vmatmul.msk.bf16.gmra.mxu0 %vm415_vm0, %v372_v46  ;;  %1616 = vmatmul.msk.bf16.gmra.mxu2 %vm415_vm0, %v381_v47 }
  0x46   : > { %1623 = vmatmul.msk.bf16.gmra.mxu1 %vm415_vm0, %v372_v46 }
  0x48   : > { %1631 = vmatmul.msk.bf16.gmra.mxu3 %vm415_vm0, %v380_v39 }
  0x55   : > { %1608 = vmatmul.msk.bf16.gmra.mxu0 %vm415_vm0, %v373_v54  ;;  %1617 = vmatmul.msk.bf16.gmra.mxu2 %vm415_vm0, %v382_v55 }
  0x56   : > { %1624 = vmatmul.msk.bf16.gmra.mxu1 %vm415_vm0, %v373_v54 }
  0x58   : > { %1632 = vmatmul.msk.bf16.gmra.mxu3 %vm415_vm0, %v381_v47 }
  0x65   : > { %1609 = vmatmul.msk.bf16.gmra.mxu0 %vm415_vm0, %v374_v62  ;;  %1618 = vmatmul.msk.bf16.gmra.mxu2 %vm415_vm0, %v383_v63 }
  0x66   : > { %1625 = vmatmul.msk.bf16.gmra.mxu1 %vm415_vm0, %v374_v62 }
  0x68   : > { %1633 = vmatmul.msk.bf16.gmra.mxu3 %vm415_vm0, %v382_v55 }
  0x75   : > { %1610 = vmatmul.msk.bf16.gmra.mxu0 %vm415_vm0, %v375_v5  ;;  %1619 = vmatmul.msk.bf16.gmra.mxu2 %vm415_vm0, %v384_v6 }
  0x76   : > { %1626 = vmatmul.msk.bf16.gmra.mxu1 %vm415_vm0, %v375_v5 }
  0x78   : > { %1634 = vmatmul.msk.bf16.gmra.mxu3 %vm415_vm0, %v383_v63 }
  0x85   : > { %1611 = vmatmul.msk.bf16.gmra.mxu0 %vm415_vm0, %v376_v11 }
  0x86   : > { %1627 = vmatmul.msk.bf16.gmra.mxu1 %vm415_vm0, %v376_v11 }
  0x88   : > { %1635 = vmatmul.msk.bf16.gmra.mxu3 %vm415_vm0, %v384_v6 }
  0x92   : > { %v473_v14 = vpop.f32.mrf.mxu0 }
  0x93   : > { %v562_v15 = vpop.f32.mrf.mxu1  ;;  %v2052_v18 = vadd.f32 %v473_v14, %v2045_v16 }
  0x94   : > { %v563_v19 = vadd.f32 %v562_v15, %v2047_v17 }
  0x95   : > { %1612 = vmatmul.msk.bf16.gmra.mxu0 %vm415_vm0, %v1938_v20  ;;  %v642_v27 = vmax.f32 %v2052_v18, 0.0 }
  0x96   : > { %v643_v28 = vmax.f32 %v563_v19, 0.0 }
  0x98   : > { %v2059_v26 = vpop.f32.mrf.mxu2 }
  0x9a   : > { %v475_v22 = vpop.f32.mrf.mxu0 }
  0x9b   : > { %v602_v21 = vpop.f32.mrf.mxu3  ;;  %v564_v23 = vpop.f32.mrf.mxu1  ;;  %v2056_v24 = vadd.f32 %v475_v22, %v2045_v16 }
  0x9c   : > { %v565_v25 = vadd.f32 %v564_v23, %v2047_v17  ;;  %v603_v31 = vadd.f32 %v602_v21, %v2047_v17 }
  0x9d   : > { %v644_v20 = vmax.f32 %v2056_v24, 0.0 }
  0x9e   : > { %v645_v29 = vmax.f32 %v565_v25, 0.0  ;;  %v675_v35 = vmax.f32 %v603_v31, 0.0 }
  0x9f   : > { %v706_v32 = vpack.c.bf16 %v644_v20, %v642_v27 }
  0xa0   : > { %v707_v33 = vpack.c.bf16 %v645_v29, %v643_v28  ;;  %v2072_v39 = vpop.f32.mrf.mxu2 }
  0xa1   : > { %878 = vmatmul.bf16.vlgmr.msrb.gmra.mxu2 %v706_v32 }
  0xa2   : > { %967 = vmatmul.bf16.vlgmr.msrb.gmra.mxu3 %v707_v33  ;;  %v478_v36 = vpop.f32.mrf.mxu0 }
  0xa3   : > { %v604_v34 = vpop.f32.mrf.mxu3  ;;  %v567_v37 = vpop.f32.mrf.mxu1  ;;  %v2077_v42 = vadd.f32 %v478_v36, %v2045_v16 }
  0xa4   : > { %v605_v38 = vadd.f32 %v604_v34, %v2047_v17  ;;  %v568_v43 = vadd.f32 %v567_v37, %v2047_v17 }
  0xa5   : > { %v646_v49 = vmax.f32 %v2077_v42, 0.0 }
  0xa6   : > { %v677_v40 = vmax.f32 %v605_v38, 0.0  ;;  %v647_v50 = vmax.f32 %v568_v43, 0.0 }
  0xa8   : > { %v2074_v41 = vpack.c.bf16 %v677_v40, %v675_v35  ;;  %v2086_v53 = vpop.f32.mrf.mxu2 }
  0xaa   : > { %v480_v45 = vpop.f32.mrf.mxu0 }
  0xab   : > { %v607_v44 = vpop.f32.mrf.mxu3  ;;  %v569_v46 = vpop.f32.mrf.mxu1  ;;  %v2081_v47 = vadd.f32 %v480_v45, %v2045_v16 }
  0xac   : > { %v570_v48 = vadd.f32 %v569_v46, %v2047_v17  ;;  %v608_v54 = vadd.f32 %v607_v44, %v2047_v17 }
  0xad   : > { %v648_v51 = vmax.f32 %v2081_v47, 0.0 }
  0xae   : > { %v649_v52 = vmax.f32 %v570_v48, 0.0  ;;  %v679_v59 = vmax.f32 %v608_v54, 0.0 }
  0xaf   : > { %v708_v55 = vpack.c.bf16 %v648_v51, %v646_v49 }
  0xb0   : > { %v709_v56 = vpack.c.bf16 %v649_v52, %v647_v50  ;;  %v2099_v1 = vpop.f32.mrf.mxu2 }
  0xb1   : > { %883 = vmatmul.bf16.gmra.mxu2 %v708_v55 }
  0xb2   : > { %972 = vmatmul.bf16.gmra.mxu3 %v709_v56  ;;  %v483_v60 = vpop.f32.mrf.mxu0 }
  0xb3   : > { %v609_v57 = vpop.f32.mrf.mxu3  ;;  %v572_v61 = vpop.f32.mrf.mxu1  ;;  %v2102_v2 = vadd.f32 %v483_v60, %v2045_v16 }
  0xb4   : > { %v610_v62 = vadd.f32 %v609_v57, %v2047_v17  ;;  %v573_v3 = vadd.f32 %v572_v61, %v2047_v17  ;;  %v1789_v61 = vld [vmem:[%s2640_s5 + $0x18] sm:$0xff] }
  0xb5   : > { %v650_v9 = vmax.f32 %v2102_v2, 0.0  ;;  %1200 = vmatpush.bf16.msrb.mxu0 %v1789_v61  ;;  %1810 = vmatpush.bf16.msra.mxu2 %v1789_v61 }
  0xb6   : > { %v681_v63 = vmax.f32 %v610_v62, 0.0  ;;  %v651_v10 = vmax.f32 %v573_v3, 0.0 }
  0xb8   : > { %v2097_v0 = vpack.c.bf16 %v681_v63, %v679_v59  ;;  %v2116_v21 = vpop.f32.mrf.mxu2 }
  0xba   : > { %v485_v5 = vpop.f32.mrf.mxu0 }
  0xbb   : > { %v612_v4 = vpop.f32.mrf.mxu3  ;;  %v574_v6 = vpop.f32.mrf.mxu1  ;;  %v2106_v7 = vadd.f32 %v485_v5, %v2045_v16 }
  0xbc   : > { %v575_v8 = vadd.f32 %v574_v6, %v2047_v17  ;;  %v613_v13 = vadd.f32 %v612_v4, %v2047_v17 }
  0xbd   : > { %v652_v11 = vmax.f32 %v2106_v7, 0.0 }
  0xbe   : > { %v653_v12 = vmax.f32 %v575_v8, 0.0  ;;  %v683_v22 = vmax.f32 %v613_v13, 0.0 }
  0xbf   : > { %v710_v14 = vpack.c.bf16 %v652_v11, %v650_v9 }
  0xc0   : > { %v711_v15 = vpack.c.bf16 %v653_v12, %v651_v10  ;;  %v2132_v40 = vpop.f32.mrf.mxu2 }
  0xc1   : > { %888 = vmatmul.bf16.gmra.mxu2 %v710_v14 }
  0xc2   : > { %977 = vmatmul.bf16.gmra.mxu3 %v711_v15  ;;  %v488_v23 = vpop.f32.mrf.mxu0 }
  0xc3   : > { %v614_v19 = vpop.f32.mrf.mxu3  ;;  %v577_v25 = vpop.f32.mrf.mxu1  ;;  %v2125_v32 = vadd.f32 %v488_v23, %v2045_v16 }
  0xc4   : > { %v615_v28 = vadd.f32 %v614_v19, %v2047_v17  ;;  %v578_v33 = vadd.f32 %v577_v25, %v2047_v17 }
  0xc5   : > { %v654_v43 = vmax.f32 %v2125_v32, 0.0 }
  0xc6   : > { %v685_v29 = vmax.f32 %v615_v28, 0.0  ;;  %v655_v44 = vmax.f32 %v578_v33, 0.0 }
  0xc8   : > { %v2122_v31 = vpack.c.bf16 %v685_v29, %v683_v22  ;;  %v2142_v60 = vpop.f32.mrf.mxu2 }
  0xca   : > { %v490_v35 = vpop.f32.mrf.mxu0 }
  0xcb   : > { %v617_v34 = vpop.f32.mrf.mxu3  ;;  %v579_v36 = vpop.f32.mrf.mxu1  ;;  %v2129_v37 = vadd.f32 %v490_v35, %v2045_v16 }
  0xcc   : > { %v580_v38 = vadd.f32 %v579_v36, %v2047_v17  ;;  %v618_v48 = vadd.f32 %v617_v34, %v2047_v17  ;;  %v1788_v36 = vld [vmem:[%s2640_s5 + $0x10] sm:$0xff] }
  0xcd   : > { %v656_v45 = vmax.f32 %v2129_v37, 0.0  ;;  %1201 = vmatpush.bf16.msrb.mxu0 %v1788_v36  ;;  %1811 = vmatpush.bf16.msra.mxu2 %v1788_v36 }
  0xce   : > { %v657_v46 = vmax.f32 %v580_v38, 0.0  ;;  %v687_v55 = vmax.f32 %v618_v48, 0.0 }
  0xcf   : > { %v712_v50 = vpack.c.bf16 %v656_v45, %v654_v43 }
  0xd0   : > { %v713_v52 = vpack.c.bf16 %v657_v46, %v655_v44  ;;  %v2164_v25 = vpop.f32.mrf.mxu2 }
  0xd1   : > { %893 = vmatmul.bf16.gmra.mxu2 %v712_v50 }
  0xd2   : > { %982 = vmatmul.bf16.gmra.mxu3 %v713_v52  ;;  %v493_v56 = vpop.f32.mrf.mxu0 }
  0xd3   : > { %v619_v54 = vpop.f32.mrf.mxu3  ;;  %v582_v57 = vpop.f32.mrf.mxu1  ;;  %v2150_v63 = vadd.f32 %v493_v56, %v2045_v16 }
  0xd4   : > { %v620_v58 = vadd.f32 %v619_v54, %v2047_v17  ;;  %v583_v3 = vadd.f32 %v582_v57, %v2047_v17 }
  0xd5   : > { %v658_v12 = vmax.f32 %v2150_v63, 0.0 }
  0xd6   : > { %v689_v59 = vmax.f32 %v620_v58, 0.0  ;;  %v659_v13 = vmax.f32 %v583_v3, 0.0 }
  0xd8   : > { %v2147_v62 = vpack.c.bf16 %v689_v59, %v687_v55  ;;  %v2176_v48 = vpop.f32.mrf.mxu2 }
  0xda   : > { %v495_v5 = vpop.f32.mrf.mxu0 }
  0xdb   : > { %v622_v4 = vpop.f32.mrf.mxu3  ;;  %v584_v6 = vpop.f32.mrf.mxu1  ;;  %v2154_v8 = vadd.f32 %v495_v5, %v2045_v16 }
  0xdc   : > { %v585_v10 = vadd.f32 %v584_v6, %v2047_v17  ;;  %v623_v19 = vadd.f32 %v622_v4, %v2047_v17 }
  0xdd   : > { %v2653_v14 = vmax.f32 %v2154_v8, 0.0 }
  0xde   : > { %v661_v15 = vmax.f32 %v585_v10, 0.0  ;;  %v691_v29 = vmax.f32 %v623_v19, 0.0 }
  0xdf   : > { %v714_v22 = vpack.c.bf16 %v2653_v14, %v658_v12 }
  0xe0   : > { %v715_v23 = vpack.c.bf16 %v661_v15, %v659_v13 }
  0xe1   : > { %898 = vmatmul.bf16.gmra.mxu2 %v714_v22  ;;  %v2190_v22 = vpop.f32.mrf.mxu2 }
  0xe2   : > { %987 = vmatmul.bf16.gmra.mxu3 %v715_v23  ;;  %v498_v30 = vpop.f32.mrf.mxu0 }
  0xe3   : > { %v624_v28 = vpop.f32.mrf.mxu3  ;;  %v587_v33 = vpop.f32.mrf.mxu1  ;;  %v2173_v44 = vadd.f32 %v498_v30, %v2045_v16 }
  0xe4   : > { %v625_v34 = vadd.f32 %v624_v28, %v2047_v17  ;;  %v588_v46 = vadd.f32 %v587_v33, %v2047_v17  ;;  %v1787_v28 = vld [vmem:[%s2640_s5 + $0x8] sm:$0xff] }
  0xe5   : > { %v2648_v57 = vmax.f32 %v2173_v44, 0.0  ;;  %1202 = vmatpush.bf16.msrb.mxu0 %v1787_v28  ;;  %1812 = vmatpush.bf16.msra.mxu2 %v1787_v28 }
  0xe6   : > { %v693_v35 = vmax.f32 %v625_v34, 0.0  ;;  %v663_v58 = vmax.f32 %v588_v46, 0.0 }
  0xe8   : > { %v2170_v38 = vpack.c.bf16 %v693_v35, %v691_v29 }
  0xea   : > { %v500_v52 = vpop.f32.mrf.mxu0 }
  0xeb   : > { %v627_v50 = vpop.f32.mrf.mxu3  ;;  %v589_v54 = vpop.f32.mrf.mxu1  ;;  %v2179_v55 = vadd.f32 %v500_v52, %v2045_v16 }
  0xec   : > { %v590_v56 = vadd.f32 %v589_v54, %v2047_v17  ;;  %v628_v3 = vadd.f32 %v627_v50, %v2047_v17 }
  0xed   : > { %v2647_v59 = vmax.f32 %v2179_v55, 0.0 }
  0xee   : > { %v665_v61 = vmax.f32 %v590_v56, 0.0  ;;  %v695_v10 = vmax.f32 %v628_v3, 0.0 }
  0xef   : > { %v716_v4 = vpack.c.bf16 %v2647_v59, %v2648_v57 }
  0xf0   : > { %v717_v5 = vpack.c.bf16 %v665_v61, %v663_v58  ;;  %v2207_v61 = vpop.f32.mrf.mxu2 }
  0xf1   : > { %903 = vmatmul.bf16.gmra.mxu2 %v716_v4 }
  0xf2   : > { %992 = vmatmul.bf16.gmra.mxu3 %v717_v5  ;;  %v503_v13 = vpop.f32.mrf.mxu0 }
  0xf3   : > { %v629_v6 = vpop.f32.mrf.mxu3  ;;  %v592_v15 = vpop.f32.mrf.mxu1  ;;  %v2198_v30 = vadd.f32 %v503_v13, %v2045_v16 }
  0xf4   : > { %v630_v19 = vadd.f32 %v629_v6, %v2047_v17  ;;  %v593_v33 = vadd.f32 %v592_v15, %v2047_v17 }
  0xf5   : > { %v2646_v52 = vmax.f32 %v2198_v30, 0.0 }
  0xf6   : > { %v697_v23 = vmax.f32 %v630_v19, 0.0  ;;  %v667_v54 = vmax.f32 %v593_v33, 0.0 }
  0xf8   : > { %v2195_v29 = vpack.c.bf16 %v697_v23, %v695_v10  ;;  %v2217_v33 = vpop.f32.mrf.mxu2 }
  0xfa   : > { %v505_v35 = vpop.f32.mrf.mxu0 }
  0xfb   : > { %v632_v34 = vpop.f32.mrf.mxu3  ;;  %v594_v36 = vpop.f32.mrf.mxu1  ;;  %v2202_v46 = vadd.f32 %v505_v35, %v2045_v16 }
  0xfc   : > { %v595_v50 = vadd.f32 %v594_v36, %v2047_v17  ;;  %v633_v3 = vadd.f32 %v632_v34, %v2047_v17 }
  0xfd   : > { %v2645_v56 = vmax.f32 %v2202_v46, 0.0 }
  0xfe   : > { %v669_v58 = vmax.f32 %v595_v50, 0.0  ;;  %v699_v10 = vmax.f32 %v633_v3, 0.0 }
  0xff   : > { %v718_v4 = vpack.c.bf16 %v2645_v56, %v2646_v52 }
 0x100   : > { %v719_v5 = vpack.c.bf16 %v669_v58, %v667_v54 }
 0x101   : > { %908 = vmatmul.bf16.gmra.mxu2 %v718_v4  ;;  %v1786_v4 = vld [vmem:[%s2640_s5] sm:$0xff] }
 0x102   : > { %997 = vmatmul.bf16.gmra.mxu3 %v719_v5  ;;  %v508_v13 = vpop.f32.mrf.mxu0  ;;  %1203 = vmatpush.bf16.msrb.mxu0 %v1786_v4 }
 0x103   : > { %v634_v6 = vpop.f32.mrf.mxu3  ;;  %v597_v15 = vpop.f32.mrf.mxu1  ;;  %v2220_v34 = vadd.f32 %v508_v13, %v2045_v16  ;;  %1813 = vmatpush.bf16.msra.mxu2 %v1786_v4 }
 0x104   : > { %v635_v19 = vadd.f32 %v634_v6, %v2047_v17  ;;  %v598_v35 = vadd.f32 %v597_v15, %v2047_v17 }
 0x105   : > { %v2652_v5 = vmax.f32 %v2220_v34, 0.0 }
 0x106   : > { %v701_v23 = vmax.f32 %v635_v19, 0.0  ;;  %v671_v6 = vmax.f32 %v598_v35, 0.0 }
 0x108   : > { %v2215_v28 = vpack.c.bf16 %v701_v23, %v699_v10 }
 0x10a   : > { %v510_v50 = vpop.f32.mrf.mxu0 }
 0x10b   : > { %v637_v36 = vpop.f32.mrf.mxu3  ;;  %v599_v54 = vpop.f32.mrf.mxu1  ;;  %v2224_v58 = vadd.f32 %v510_v50, %v2045_v16 }
 0x10c   : > { %v600_v3 = vadd.f32 %v599_v54, %v2047_v17  ;;  %v638_v15 = vadd.f32 %v637_v36, %v2047_v17  ;;  %v2237_v54 = vpop.f32.mrf.mxu2 }
 0x10d   : > { %v2651_v10 = vmax.f32 %v2224_v58, 0.0 }
 0x10e   : > { %v673_v13 = vmax.f32 %v600_v3, 0.0  ;;  %v703_v56 = vmax.f32 %v638_v15, 0.0 }
 0x10f   : > { %v720_v19 = vpack.c.bf16 %v2651_v10, %v2652_v5 }
 0x110   : > { %v721_v23 = vpack.c.bf16 %v673_v13, %v671_v6 }
 0x111   : > { %913 = vmatmul.bf16.gmra.mxu2 %v720_v19 }
 0x112   : > { %1002 = vmatmul.bf16.gmra.mxu3 %v721_v23  ;;  %v513_v35 = vpop.f32.mrf.mxu0  ;;  %v2264_v23 = vadd.f32 %v2059_v26, %v2045_v16 }
 0x113   : > { %v639_v50 = vpop.f32.mrf.mxu3  ;;  %v2243_v36 = vadd.f32 %v513_v35, %v2045_v16 }
 0x114   : > { %v640_v52 = vadd.f32 %v639_v50, %v2047_v17  ;;  %v2248_v6 = vpop.f32.mrf.mxu2  ;;  %v2268_v50 = vadd.f32 %v2072_v39, %v2045_v16 }
 0x115   : > { %v2650_v13 = vmax.f32 %v2243_v36, 0.0 }
 0x116   : > { %v705_v3 = vmax.f32 %v640_v52, 0.0  ;;  %v2260_v52 = vld [vmem:[%s2639_s4] ss:$0 sm:$0xff] }
 0x118   : > { %v2240_v59 = vpack.c.bf16 %v705_v3, %v703_v56  ;;  %v678_v3 = vmax.f32 %v2264_v23, 0.0 }
 0x11a   : > { %v515_v4 = vpop.f32.mrf.mxu0 }
 0x11b   : > { %v2246_v57 = vadd.f32 %v515_v4, %v2045_v16 }
 0x11d   : > { %v2649_v19 = vmax.f32 %v2246_v57, 0.0 }
 0x11f   : > { %v722_v17 = vpack.c.bf16 %v2649_v19, %v2650_v13 }
 0x121   : > { %918 = vmatmul.bf16.gmra.mxu2 %v722_v17  ;;  %v1801_v17 = vld [vmem:[%s2642_s7 + $0x38] sm:$0xff] }
 0x122   : > { %1007 = vmatmul.bf16.gmra.mxu3 %v2074_v41  ;;  %v680_v41 = vmax.f32 %v2268_v50, 0.0  ;;  %1401 = vmatpush.bf16.msrb.mxu1 %v1801_v17 }
 0x124   : > { %v879_v56 = vpop.f32.mrf.mxu2  ;;  %v724_v39 = vpack.c.bf16 %v680_v41, %v678_v3 }
 0x125   : > { %v968_v15 = vpop.f32.mrf.mxu3  ;;  %v880_v35 = vadd.f32 %v2260_v52, %v879_v56 }
 0x127   : > { %v969_v4 = vadd.f32 %v968_v15, %v880_v35 }
 0x129   : > { %v1048_v10 = vmax.f32 %v969_v4, 0.0  ;;  %v2292_v4 = vadd.f32 %v2099_v1, %v2045_v16 }
 0x12b   : > { %v1080_v15 = vadd.f32 %v1048_v10, %v642_v27  ;;  %v684_v27 = vmax.f32 %v2292_v4, 0.0 }
 0x12c   : > { %v881_v19 = vpop.f32.mrf.mxu2 }
 0x12d   : > { %v970_v13 = vpop.f32.mrf.mxu3  ;;  %v882_v26 = vadd.f32 %v2260_v52, %v881_v19 }
 0x12f   : > { %v971_v5 = vadd.f32 %v970_v13, %v882_v26  ;;  %v2288_v13 = vadd.f32 %v2086_v53, %v2045_v16 }
 0x131   : > { %v1049_v56 = vmax.f32 %v971_v5, 0.0  ;;  %923 = vmatmul.bf16.gmra.mxu2 %v724_v39  ;;  %v682_v18 = vmax.f32 %v2288_v13, 0.0 }
 0x132   : > { %1012 = vmatmul.bf16.gmra.mxu3 %v2097_v0 }
 0x133   : > { %v1081_v35 = vadd.f32 %v1049_v56, %v644_v20  ;;  %v1800_v20 = vld [vmem:[%s2642_s7 + $0x30] sm:$0xff] }
 0x134   : > { %v884_v14 = vpop.f32.mrf.mxu2  ;;  %1402 = vmatpush.bf16.msrb.mxu1 %v1800_v20 }
 0x135   : > { %v973_v19 = vpop.f32.mrf.mxu3  ;;  %v1112_v17 = vpack.c.bf16 %v1081_v35, %v1080_v15  ;;  %v885_v5 = vadd.f32 %v2260_v52, %v884_v14  ;;  %v726_v14 = vpack.c.bf16 %v684_v27, %v682_v18 }
 0x137   : > { %1204 = vmatmul.bf16.vlgmr.msrb.gmra.mxu0 %v1112_v17  ;;  %v974_v24 = vadd.f32 %v973_v19, %v885_v5  ;;  %v2312_v5 = vadd.f32 %v2116_v21, %v2045_v16 }
 0x139   : > { %v1050_v26 = vmax.f32 %v974_v24, 0.0  ;;  %v2316_v24 = vadd.f32 %v2132_v40, %v2045_v16  ;;  %v686_v42 = vmax.f32 %v2312_v5, 0.0 }
 0x13b   : > { %v1082_v56 = vadd.f32 %v1050_v26, %v646_v49  ;;  %v688_v49 = vmax.f32 %v2316_v24, 0.0 }
 0x13c   : > { %v886_v0 = vpop.f32.mrf.mxu2 }
 0x13d   : > { %v975_v10 = vpop.f32.mrf.mxu3  ;;  %v887_v53 = vadd.f32 %v2260_v52, %v886_v0 }
 0x13f   : > { %v976_v1 = vadd.f32 %v975_v10, %v887_v53  ;;  %v728_v53 = vpack.c.bf16 %v688_v49, %v686_v42 }
 0x141   : > { %v1051_v39 = vmax.f32 %v976_v1, 0.0  ;;  %928 = vmatmul.bf16.gmra.mxu2 %v726_v14 }
 0x142   : > { %1017 = vmatmul.bf16.gmra.mxu3 %v2122_v31 }
 0x143   : > { %v1083_v15 = vadd.f32 %v1051_v39, %v648_v51  ;;  %v1799_v51 = vld [vmem:[%s2642_s7 + $0x28] sm:$0xff] }
 0x144   : > { %v889_v35 = vpop.f32.mrf.mxu2  ;;  %1403 = vmatpush.bf16.msrb.mxu1 %v1799_v51 }
 0x145   : > { %v978_v19 = vpop.f32.mrf.mxu3  ;;  %v1113_v17 = vpack.c.bf16 %v1083_v15, %v1082_v56  ;;  %v890_v20 = vadd.f32 %v2260_v52, %v889_v35  ;;  %v2336_v35 = vadd.f32 %v2142_v60, %v2045_v16 }
 0x147   : > { %1209 = vmatmul.bf16.gmra.mxu0 %v1113_v17  ;;  %v979_v47 = vadd.f32 %v978_v19, %v890_v20  ;;  %v2340_v19 = vadd.f32 %v2164_v25, %v2045_v16  ;;  %v690_v2 = vmax.f32 %v2336_v35, 0.0 }
 0x149   : > { %v1052_v10 = vmax.f32 %v979_v47, 0.0 }
 0x14b   : > { %v1084_v1 = vadd.f32 %v1052_v10, %v650_v9  ;;  %v692_v9 = vmax.f32 %v2340_v19, 0.0 }
 0x14c   : > { %v891_v31 = vpop.f32.mrf.mxu2 }
 0x14d   : > { %v980_v0 = vpop.f32.mrf.mxu3  ;;  %v892_v21 = vadd.f32 %v2260_v52, %v891_v31  ;;  %v730_v51 = vpack.c.bf16 %v692_v9, %v690_v2 }
 0x14f   : > { %v981_v40 = vadd.f32 %v980_v0, %v892_v21 }
 0x151   : > { %v1053_v26 = vmax.f32 %v981_v40, 0.0  ;;  %933 = vmatmul.bf16.gmra.mxu2 %v728_v53 }
 0x152   : > { %1022 = vmatmul.bf16.gmra.mxu3 %v2147_v62 }
 0x153   : > { %v1085_v14 = vadd.f32 %v1053_v26, %v652_v11  ;;  %v1798_v11 = vld [vmem:[%s2642_s7 + $0x20] sm:$0xff]  ;;  %v2360_v26 = vadd.f32 %v2176_v48, %v2045_v16 }
 0x154   : > { %v894_v39 = vpop.f32.mrf.mxu2  ;;  %1404 = vmatpush.bf16.msrb.mxu1 %v1798_v11  ;;  %v2654_v11 = vmax.f32 %v2154_v8, 0.0 }
 0x155   : > { %v983_v56 = vpop.f32.mrf.mxu3  ;;  %v1114_v15 = vpack.c.bf16 %v1085_v14, %v1084_v1  ;;  %v895_v17 = vadd.f32 %v2260_v52, %v894_v39  ;;  %v2364_v1 = vadd.f32 %v2190_v22, %v2045_v16  ;;  %v694_v32 = vmax.f32 %v2360_v26, 0.0 }
 0x157   : > { %1214 = vmatmul.bf16.gmra.mxu0 %v1114_v15  ;;  %v984_v7 = vadd.f32 %v983_v56, %v895_v17 }
 0x159   : > { %v1054_v47 = vmax.f32 %v984_v7, 0.0 }
 0x15b   : > { %v1086_v0 = vadd.f32 %v1054_v47, %v654_v43  ;;  %v696_v43 = vmax.f32 %v2364_v1, 0.0 }
 0x15c   : > { %v896_v62 = vpop.f32.mrf.mxu2 }
 0x15d   : > { %v985_v20 = vpop.f32.mrf.mxu3  ;;  %v897_v60 = vadd.f32 %v2260_v52, %v896_v62  ;;  %v732_v15 = vpack.c.bf16 %v696_v43, %v694_v32 }
 0x15f   : > { %v986_v25 = vadd.f32 %v985_v20, %v897_v60 }
 0x161   : > { %v1055_v31 = vmax.f32 %v986_v25, 0.0  ;;  %938 = vmatmul.bf16.gmra.mxu2 %v730_v51  ;;  %v2384_v25 = vadd.f32 %v2207_v61, %v2045_v16  ;;  %v2388_v51 = vadd.f32 %v2217_v33, %v2045_v16 }
 0x162   : > { %1027 = vmatmul.bf16.gmra.mxu3 %v2170_v38 }
 0x163   : > { %v1087_v21 = vadd.f32 %v1055_v31, %v656_v45  ;;  %v1797_v45 = vld [vmem:[%s2642_s7 + $0x18] sm:$0xff]  ;;  %v698_v63 = vmax.f32 %v2384_v25, 0.0 }
 0x164   : > { %v899_v10 = vpop.f32.mrf.mxu2  ;;  %1405 = vmatpush.bf16.msrb.mxu1 %v1797_v45  ;;  %v2656_v45 = vmax.f32 %v2179_v55, 0.0 }
 0x165   : > { %v988_v40 = vpop.f32.mrf.mxu3  ;;  %v1115_v53 = vpack.c.bf16 %v1087_v21, %v1086_v0  ;;  %v900_v14 = vadd.f32 %v2260_v52, %v899_v10 }
 0x167   : > { %1219 = vmatmul.bf16.gmra.mxu0 %v1115_v53  ;;  %v989_v37 = vadd.f32 %v988_v40, %v900_v14  ;;  %v2655_v14 = vmax.f32 %v2173_v44, 0.0 }
 0x169   : > { %v1056_v56 = vmax.f32 %v989_v37, 0.0 }
 0x16b   : > { %v1088_v7 = vadd.f32 %v1056_v56, %v658_v12  ;;  %v700_v12 = vmax.f32 %v2388_v51, 0.0 }
 0x16c   : > { %v901_v38 = vpop.f32.mrf.mxu2 }
 0x16d   : > { %v990_v39 = vpop.f32.mrf.mxu3  ;;  %v902_v48 = vadd.f32 %v2260_v52, %v901_v38  ;;  %v734_v40 = vpack.c.bf16 %v700_v12, %v698_v63 }
 0x16f   : > { %v991_v22 = vadd.f32 %v990_v39, %v902_v48 }
 0x171   : > { %v1057_v17 = vmax.f32 %v991_v22, 0.0  ;;  %943 = vmatmul.bf16.gmra.mxu2 %v732_v15  ;;  %v2408_v22 = vadd.f32 %v2237_v54, %v2045_v16  ;;  %v2412_v15 = vadd.f32 %v2248_v6, %v2045_v16 }
 0x172   : > { %1032 = vmatmul.bf16.gmra.mxu3 %v2195_v29  ;;  %v1796_v29 = vld [vmem:[%s2642_s7 + $0x10] sm:$0xff] }
 0x173   : > { %v1089_v62 = vadd.f32 %v1057_v17, %v2654_v11  ;;  %1406 = vmatpush.bf16.msrb.mxu1 %v1796_v29  ;;  %v702_v44 = vmax.f32 %v2408_v22, 0.0 }
 0x174   : > { %v904_v20 = vpop.f32.mrf.mxu2 }
 0x175   : > { %v993_v60 = vpop.f32.mrf.mxu3  ;;  %v1116_v47 = vpack.c.bf16 %v1089_v62, %v1088_v7  ;;  %v905_v31 = vadd.f32 %v2260_v52, %v904_v20  ;;  %v1795_v7 = vld [vmem:[%s2642_s7 + $0x8] sm:$0xff] }
 0x177   : > { %1224 = vmatmul.bf16.gmra.mxu0 %v1116_v47  ;;  %v994_v8 = vadd.f32 %v993_v60, %v905_v31  ;;  %1407 = vmatpush.bf16.msrb.mxu1 %v1795_v7  ;;  %v2657_v47 = vmax.f32 %v2198_v30, 0.0 }
 0x179   : > { %v1058_v10 = vmax.f32 %v994_v8, 0.0  ;;  %v2658_v8 = vmax.f32 %v2202_v46, 0.0 }
 0x17b   : > { %v1090_v37 = vadd.f32 %v1058_v10, %v2655_v14 }
 0x17c   : > { %v906_v0 = vpop.f32.mrf.mxu2 }
 0x17d   : > { %v995_v21 = vpop.f32.mrf.mxu3  ;;  %v907_v61 = vadd.f32 %v2260_v52, %v906_v0 }
 0x17f   : > { %v996_v33 = vadd.f32 %v995_v21, %v907_v61 }
 0x181   : > { %v1059_v53 = vmax.f32 %v996_v33, 0.0  ;;  %948 = vmatmul.bf16.gmra.mxu2 %v734_v40  ;;  %v1794_v40 = vld [vmem:[%s2642_s7] sm:$0xff] }
 0x182   : > { %1037 = vmatmul.bf16.gmra.mxu3 %v2215_v28  ;;  %v704_v28 = vmax.f32 %v2412_v15, 0.0  ;;  %1408 = vmatpush.bf16.msrb.mxu1 %v1794_v40 }
 0x183   : > { %v1091_v38 = vadd.f32 %v1059_v53, %v2656_v45  ;;  %v2659_v45 = vmax.f32 %v2220_v34, 0.0  ;;  %v2661_v34 = vmax.f32 %v2243_v36, 0.0 }
 0x184   : > { %v909_v39 = vpop.f32.mrf.mxu2  ;;  %v736_v6 = vpack.c.bf16 %v704_v28, %v702_v44 }
 0x185   : > { %v998_v48 = vpop.f32.mrf.mxu3  ;;  %v1117_v56 = vpack.c.bf16 %v1091_v38, %v1090_v37  ;;  %v910_v17 = vadd.f32 %v2260_v52, %v909_v39  ;;  %v2660_v39 = vmax.f32 %v2224_v58, 0.0  ;;  %v2662_v58 = vmax.f32 %v2246_v57, 0.0 }
 0x187   : > { %1229 = vmatmul.bf16.gmra.mxu0 %v1117_v56  ;;  %v999_v55 = vadd.f32 %v998_v48, %v910_v17 }
 0x189   : > { %v1060_v20 = vmax.f32 %v999_v55, 0.0 }
 0x18b   : > { %v1092_v31 = vadd.f32 %v1060_v20, %v2657_v47 }
 0x18c   : > { %v911_v11 = vpop.f32.mrf.mxu2 }
 0x18d   : > { %v1000_v62 = vpop.f32.mrf.mxu3  ;;  %v912_v54 = vadd.f32 %v2260_v52, %v911_v11 }
 0x18f   : > { %v1001_v16 = vadd.f32 %v1000_v62, %v912_v54 }
 0x191   : > { %v1061_v60 = vmax.f32 %v1001_v16, 0.0  ;;  %953 = vmatmul.bf16.gmra.mxu2 %v736_v6 }
 0x192   : > { %1042 = vmatmul.bf16.gmra.mxu3 %v2240_v59 }
 0x193   : > { %v1093_v29 = vadd.f32 %v1061_v60, %v2658_v8 }
 0x194   : > { %v914_v0 = vpop.f32.mrf.mxu2 }
 0x195   : > { %v1003_v21 = vpop.f32.mrf.mxu3  ;;  %v1118_v61 = vpack.c.bf16 %v1093_v29, %v1092_v31  ;;  %v915_v10 = vadd.f32 %v2260_v52, %v914_v0 }
 0x197   : > { %1234 = vmatmul.bf16.gmra.mxu0 %v1118_v61  ;;  %v1004_v33 = vadd.f32 %v1003_v21, %v915_v10  ;;  %v2449_v10 = vld [vmem:[%s2641_s6] ss:$0 sm:$0xff] }
 0x199   : > { %v1062_v30 = vmax.f32 %v1004_v33, 0.0 }
 0x19b   : > { %v1094_v38 = vadd.f32 %v1062_v30, %v2659_v45 }
 0x19c   : > { %v916_v53 = vpop.f32.mrf.mxu2 }
 0x19d   : > { %v1005_v14 = vpop.f32.mrf.mxu3  ;;  %v917_v59 = vadd.f32 %v2260_v52, %v916_v53 }
 0x19f   : > { %v1006_v37 = vadd.f32 %v1005_v14, %v917_v59 }
 0x1a1   : > { %v1063_v46 = vmax.f32 %v1006_v37, 0.0 }
 0x1a3   : > { %v1095_v48 = vadd.f32 %v1063_v46, %v2660_v39 }
 0x1a4   : > { %v919_v56 = vpop.f32.mrf.mxu2 }
 0x1a5   : > { %v1008_v17 = vpop.f32.mrf.mxu3  ;;  %v1119_v55 = vpack.c.bf16 %v1095_v48, %v1094_v38  ;;  %v920_v7 = vadd.f32 %v2260_v52, %v919_v56 }
 0x1a7   : > { %1239 = vmatmul.bf16.gmra.mxu0 %v1119_v55  ;;  %v1009_v11 = vadd.f32 %v1008_v17, %v920_v7 }
 0x1a9   : > { %v1064_v16 = vmax.f32 %v1009_v11, 0.0 }
 0x1ab   : > { %v1096_v47 = vadd.f32 %v1064_v16, %v2661_v34 }
 0x1ac   : > { %v921_v62 = vpop.f32.mrf.mxu2 }
 0x1ad   : > { %v1010_v54 = vpop.f32.mrf.mxu3  ;;  %v922_v20 = vadd.f32 %v2260_v52, %v921_v62 }
 0x1af   : > { %v1011_v6 = vadd.f32 %v1010_v54, %v922_v20 }
 0x1b1   : > { %v1065_v60 = vmax.f32 %v1011_v6, 0.0 }
 0x1b3   : > { %v1097_v31 = vadd.f32 %v1065_v60, %v2662_v58 }
 0x1b4   : > { %v924_v8 = vpop.f32.mrf.mxu2  ;;  %v1205_v0 = vpop.f32.mrf.mxu0 }
 0x1b5   : > { %v1013_v29 = vpop.f32.mrf.mxu3  ;;  %v1120_v21 = vpack.c.bf16 %v1097_v31, %v1096_v47  ;;  %v925_v61 = vadd.f32 %v2260_v52, %v924_v8  ;;  %v1206_v40 = vadd.f32 %v2449_v10, %v1205_v0 }
 0x1b7   : > { %1244 = vmatmul.bf16.gmra.mxu0 %v1120_v21  ;;  %v1014_v33 = vadd.f32 %v1013_v29, %v925_v61  ;;  %v1285_v46 = vmax.f32 %v1206_v40, 0.0 }
 0x1b9   : > { %v1066_v30 = vmax.f32 %v1014_v33, 0.0 }
 0x1bb   : > { %v1098_v48 = vadd.f32 %v1066_v30, %v678_v3 }
 0x1bc   : > { %v926_v36 = vpop.f32.mrf.mxu2  ;;  %v1207_v14 = vpop.f32.mrf.mxu0 }
 0x1bd   : > { %v1015_v53 = vpop.f32.mrf.mxu3  ;;  %v927_v57 = vadd.f32 %v2260_v52, %v926_v36  ;;  %v1208_v59 = vadd.f32 %v2449_v10, %v1207_v14 }
 0x1bf   : > { %v1016_v37 = vadd.f32 %v1015_v53, %v927_v57  ;;  %v1286_v45 = vmax.f32 %v1208_v59, 0.0 }
 0x1c1   : > { %v1067_v38 = vmax.f32 %v1016_v37, 0.0  ;;  %v1317_v39 = vpack.c.bf16 %v1286_v45, %v1285_v46 }
 0x1c3   : > { %v1099_v56 = vadd.f32 %v1067_v38, %v680_v41  ;;  %1409 = vmatmul.bf16.vlgmr.msrb.gmra.mxu1 %v1317_v39 }
 0x1c4   : > { %v929_v17 = vpop.f32.mrf.mxu2  ;;  %v1210_v7 = vpop.f32.mrf.mxu0 }
 0x1c5   : > { %v1018_v55 = vpop.f32.mrf.mxu3  ;;  %v1121_v11 = vpack.c.bf16 %v1099_v56, %v1098_v48  ;;  %v930_v62 = vadd.f32 %v2260_v52, %v929_v17  ;;  %v1211_v20 = vadd.f32 %v2449_v10, %v1210_v7 }
 0x1c7   : > { %1249 = vmatmul.bf16.gmra.mxu0 %v1121_v11  ;;  %v1019_v54 = vadd.f32 %v1018_v55, %v930_v62  ;;  %v1287_v34 = vmax.f32 %v1211_v20, 0.0 }
 0x1c9   : > { %v1068_v50 = vmax.f32 %v1019_v54, 0.0 }
 0x1cb   : > { %v1100_v8 = vadd.f32 %v1068_v50, %v682_v18 }
 0x1cc   : > { %v931_v16 = vpop.f32.mrf.mxu2  ;;  %v1212_v23 = vpop.f32.mrf.mxu0 }
 0x1cd   : > { %v1020_v6 = vpop.f32.mrf.mxu3  ;;  %v932_v60 = vadd.f32 %v2260_v52, %v931_v16  ;;  %v1213_v3 = vadd.f32 %v2449_v10, %v1212_v23 }
 0x1cf   : > { %v1021_v41 = vadd.f32 %v1020_v6, %v932_v60  ;;  %v1288_v47 = vmax.f32 %v1213_v3, 0.0 }
 0x1d1   : > { %v1069_v58 = vmax.f32 %v1021_v41, 0.0  ;;  %v1318_v31 = vpack.c.bf16 %v1288_v47, %v1287_v34 }
 0x1d3   : > { %v1101_v29 = vadd.f32 %v1069_v58, %v684_v27  ;;  %1414 = vmatmul.bf16.gmra.mxu1 %v1318_v31 }
 0x1d4   : > { %v934_v0 = vpop.f32.mrf.mxu2  ;;  %v1215_v61 = vpop.f32.mrf.mxu0 }
 0x1d5   : > { %v1023_v21 = vpop.f32.mrf.mxu3  ;;  %v1122_v33 = vpack.c.bf16 %v1101_v29, %v1100_v8  ;;  %v935_v40 = vadd.f32 %v2260_v52, %v934_v0  ;;  %v1216_v53 = vadd.f32 %v2449_v10, %v1215_v61 }
 0x1d7   : > { %1254 = vmatmul.bf16.gmra.mxu0 %v1122_v33  ;;  %v1024_v36 = vadd.f32 %v1023_v21, %v935_v40  ;;  %v1289_v30 = vmax.f32 %v1216_v53, 0.0 }
 0x1d9   : > { %v1070_v4 = vmax.f32 %v1024_v36, 0.0 }
 0x1db   : > { %v1102_v38 = vadd.f32 %v1070_v4, %v686_v42 }
 0x1dc   : > { %v936_v57 = vpop.f32.mrf.mxu2  ;;  %v1217_v13 = vpop.f32.mrf.mxu0 }
 0x1dd   : > { %v1025_v14 = vpop.f32.mrf.mxu3  ;;  %v937_v59 = vadd.f32 %v2260_v52, %v936_v57  ;;  %v1218_v18 = vadd.f32 %v2449_v10, %v1217_v13 }
 0x1df   : > { %v1026_v27 = vadd.f32 %v1025_v14, %v937_v59  ;;  %v1290_v37 = vmax.f32 %v1218_v18, 0.0 }
 0x1e1   : > { %v1071_v46 = vmax.f32 %v1026_v27, 0.0  ;;  %v1319_v45 = vpack.c.bf16 %v1290_v37, %v1289_v30 }
 0x1e3   : > { %v1103_v39 = vadd.f32 %v1071_v46, %v688_v49  ;;  %1419 = vmatmul.bf16.gmra.mxu1 %v1319_v45 }
 0x1e4   : > { %v939_v48 = vpop.f32.mrf.mxu2  ;;  %v1220_v17 = vpop.f32.mrf.mxu0 }
 0x1e5   : > { %v1028_v56 = vpop.f32.mrf.mxu3  ;;  %v1123_v55 = vpack.c.bf16 %v1103_v39, %v1102_v38  ;;  %v940_v7 = vadd.f32 %v2260_v52, %v939_v48  ;;  %v1221_v62 = vadd.f32 %v2449_v10, %v1220_v17 }
 0x1e7   : > { %1259 = vmatmul.bf16.gmra.mxu0 %v1123_v55  ;;  %v1029_v11 = vadd.f32 %v1028_v56, %v940_v7  ;;  %v1291_v6 = vmax.f32 %v1221_v62, 0.0 }
 0x1e9   : > { %v1072_v24 = vmax.f32 %v1029_v11, 0.0 }
 0x1eb   : > { %v1104_v50 = vadd.f32 %v1072_v24, %v690_v2 }
 0x1ec   : > { %v941_v54 = vpop.f32.mrf.mxu2  ;;  %v1222_v5 = vpop.f32.mrf.mxu0 }
 0x1ed   : > { %v1030_v20 = vpop.f32.mrf.mxu3  ;;  %v942_v16 = vadd.f32 %v2260_v52, %v941_v54  ;;  %v1223_v42 = vadd.f32 %v2449_v10, %v1222_v5 }
 0x1ef   : > { %v1031_v49 = vadd.f32 %v1030_v20, %v942_v16  ;;  %v1292_v60 = vmax.f32 %v1223_v42, 0.0 }
 0x1f1   : > { %v1073_v23 = vmax.f32 %v1031_v49, 0.0  ;;  %v1320_v3 = vpack.c.bf16 %v1292_v60, %v1291_v6 }
 0x1f3   : > { %v1105_v41 = vadd.f32 %v1073_v23, %v692_v9  ;;  %1424 = vmatmul.bf16.gmra.mxu1 %v1320_v3 }
 0x1f4   : > { %v944_v34 = vpop.f32.mrf.mxu2  ;;  %v1225_v58 = vpop.f32.mrf.mxu0 }
 0x1f5   : > { %v1033_v47 = vpop.f32.mrf.mxu3  ;;  %v1124_v31 = vpack.c.bf16 %v1105_v41, %v1104_v50  ;;  %v945_v8 = vadd.f32 %v2260_v52, %v944_v34  ;;  %v1226_v0 = vadd.f32 %v2449_v10, %v1225_v58 }
 0x1f7   : > { %1264 = vmatmul.bf16.gmra.mxu0 %v1124_v31  ;;  %v1034_v29 = vadd.f32 %v1033_v47, %v945_v8  ;;  %v1293_v40 = vmax.f32 %v1226_v0, 0.0 }
 0x1f9   : > { %v1074_v19 = vmax.f32 %v1034_v29, 0.0 }
 0x1fb   : > { %v1106_v14 = vadd.f32 %v1074_v19, %v694_v32 }
 0x1fc   : > { %v946_v21 = vpop.f32.mrf.mxu2  ;;  %v1227_v35 = vpop.f32.mrf.mxu0 }
 0x1fd   : > { %v1035_v61 = vpop.f32.mrf.mxu3  ;;  %v947_v33 = vadd.f32 %v2260_v52, %v946_v21  ;;  %v1228_v2 = vadd.f32 %v2449_v10, %v1227_v35 }
 0x1ff   : > { %v1036_v9 = vadd.f32 %v1035_v61, %v947_v33  ;;  %v1294_v36 = vmax.f32 %v1228_v2, 0.0 }
 0x201   : > { %v1075_v53 = vmax.f32 %v1036_v9, 0.0  ;;  %v1321_v57 = vpack.c.bf16 %v1294_v36, %v1293_v40 }
 0x203   : > { %v1107_v59 = vadd.f32 %v1075_v53, %v696_v43  ;;  %1429 = vmatmul.bf16.gmra.mxu1 %v1321_v57 }
 0x204   : > { %v949_v13 = vpop.f32.mrf.mxu2  ;;  %v1230_v4 = vpop.f32.mrf.mxu0 }
 0x205   : > { %v1038_v18 = vpop.f32.mrf.mxu3  ;;  %v1125_v27 = vpack.c.bf16 %v1107_v59, %v1106_v14  ;;  %v950_v30 = vadd.f32 %v2260_v52, %v949_v13  ;;  %v1231_v46 = vadd.f32 %v2449_v10, %v1230_v4 }
 0x207   : > { %1269 = vmatmul.bf16.gmra.mxu0 %v1125_v27  ;;  %v1039_v37 = vadd.f32 %v1038_v18, %v950_v30  ;;  %v1295_v48 = vmax.f32 %v1231_v46, 0.0 }
 0x209   : > { %v1076_v1 = vmax.f32 %v1039_v37, 0.0 }
 0x20b   : > { %v1108_v7 = vadd.f32 %v1076_v1, %v698_v63 }
 0x20c   : > { %v951_v45 = vpop.f32.mrf.mxu2  ;;  %v1232_v26 = vpop.f32.mrf.mxu0 }
 0x20d   : > { %v1040_v38 = vpop.f32.mrf.mxu3  ;;  %v952_v39 = vadd.f32 %v2260_v52, %v951_v45  ;;  %v1233_v32 = vadd.f32 %v2449_v10, %v1232_v26 }
 0x20f   : > { %v1041_v43 = vadd.f32 %v1040_v38, %v952_v39  ;;  %v1296_v56 = vmax.f32 %v1233_v32, 0.0 }
 0x211   : > { %v1077_v17 = vmax.f32 %v1041_v43, 0.0  ;;  %v1322_v55 = vpack.c.bf16 %v1296_v56, %v1295_v48 }
 0x213   : > { %v1109_v11 = vadd.f32 %v1077_v17, %v700_v12  ;;  %1434 = vmatmul.bf16.gmra.mxu1 %v1322_v55 }
 0x214   : > { %v954_v62 = vpop.f32.mrf.mxu2  ;;  %v1235_v20 = vpop.f32.mrf.mxu0 }
 0x215   : > { %v1043_v54 = vpop.f32.mrf.mxu3  ;;  %v1126_v16 = vpack.c.bf16 %v1109_v11, %v1108_v7  ;;  %v955_v5 = vadd.f32 %v2260_v52, %v954_v62  ;;  %v1236_v24 = vadd.f32 %v2449_v10, %v1235_v20 }
 0x217   : > { %1274 = vmatmul.bf16.gmra.mxu0 %v1126_v16  ;;  %v1044_v42 = vadd.f32 %v1043_v54, %v955_v5  ;;  %v1297_v23 = vmax.f32 %v1236_v24, 0.0 }
 0x219   : > { %v1078_v51 = vmax.f32 %v1044_v42, 0.0 }
 0x21b   : > { %v1110_v34 = vadd.f32 %v1078_v51, %v702_v44 }
 0x21c   : > { %v956_v49 = vpop.f32.mrf.mxu2  ;;  %v1237_v60 = vpop.f32.mrf.mxu0 }
 0x21d   : > { %v957_v6 = vadd.f32 %v2260_v52, %v956_v49  ;;  %v1045_v25 = vpop.f32.mrf.mxu3  ;;  %v1238_v63 = vadd.f32 %v2449_v10, %v1237_v60 }
 0x21f   : > { %v1046_v12 = vadd.f32 %v1045_v25, %v957_v6  ;;  %v1298_v3 = vmax.f32 %v1238_v63, 0.0 }
 0x221   : > { %v1079_v50 = vmax.f32 %v1046_v12, 0.0  ;;  %v1323_v41 = vpack.c.bf16 %v1298_v3, %v1297_v23 }
 0x223   : > { %v1111_v47 = vadd.f32 %v1079_v50, %v704_v28  ;;  %1439 = vmatmul.bf16.gmra.mxu1 %v1323_v41  ;;  %v2513_v28 = vld [vmem:[%s2643_s8] ss:$0 sm:$0xff] }
 0x224   : > { %v1240_v31 = vpop.f32.mrf.mxu0 }
 0x225   : > { %v1127_v58 = vpack.c.bf16 %v1111_v47, %v1110_v34  ;;  %v1241_v52 = vadd.f32 %v2449_v10, %v1240_v31 }
 0x227   : > { %1279 = vmatmul.bf16.vlgmr.msra.gmra.mxu2 %v1127_v58  ;;  %v1299_v0 = vmax.f32 %v1241_v52, 0.0 }
 0x22c   : > { %v1242_v8 = vpop.f32.mrf.mxu0 }
 0x22d   : > { %v1243_v29 = vadd.f32 %v2449_v10, %v1242_v8 }
 0x22f   : > { %v1300_v21 = vmax.f32 %v1243_v29, 0.0 }
 0x231   : > { %v1324_v61 = vpack.c.bf16 %v1300_v21, %v1299_v0 }
 0x233   : > { %1444 = vmatmul.bf16.gmra.mxu1 %v1324_v61 }
 0x234   : > { %v1245_v33 = vpop.f32.mrf.mxu0 }
 0x235   : > { %v1246_v22 = vadd.f32 %v2449_v10, %v1245_v33 }
 0x237   : > { %v1301_v35 = vmax.f32 %v1246_v22, 0.0 }
 0x23c   : > { %v1247_v44 = vpop.f32.mrf.mxu0 }
 0x23d   : > { %v1248_v15 = vadd.f32 %v2449_v10, %v1247_v44 }
 0x23f   : > { %v1302_v2 = vmax.f32 %v1248_v15, 0.0 }
 0x240   : > { %v1410_v19 = vpop.f32.mrf.mxu1 }
 0x241   : > { %v1325_v9 = vpack.c.bf16 %v1302_v2, %v1301_v35  ;;  %v1411_v40 = vadd.f32 %v2513_v28, %v1410_v19 }
 0x243   : > { %1491 = vst.msk [vmem:[%s2520_s14] sm:$0xff] %vm1490_vm1, %v1411_v40  ;;  %1449 = vmatmul.bf16.gmra.mxu1 %v1325_v9 }
 0x244   : > { %v1250_v36 = vpop.f32.mrf.mxu0 }
 0x245   : > { %v1251_v14 = vadd.f32 %v2449_v10, %v1250_v36 }
 0x247   : > { %v1303_v18 = vmax.f32 %v1251_v14, 0.0 }
 0x248   : > { %v1412_v53 = vpop.f32.mrf.mxu1 }
 0x249   : > { %v1413_v57 = vadd.f32 %v2513_v28, %v1412_v53 }
 0x24b   : > { %1492 = vst.msk [vmem:[%s2520_s14 + $0x8] sm:$0xff] %vm1490_vm1, %v1413_v57 }
 0x24c   : > { %v1252_v59 = vpop.f32.mrf.mxu0 }
 0x24d   : > { %v1253_v13 = vadd.f32 %v2449_v10, %v1252_v59 }
 0x24f   : > { %v1304_v4 = vmax.f32 %v1253_v13, 0.0 }
 0x250   : > { %v1415_v27 = vpop.f32.mrf.mxu1 }
 0x251   : > { %v1326_v30 = vpack.c.bf16 %v1304_v4, %v1303_v18  ;;  %v1416_v37 = vadd.f32 %v2513_v28, %v1415_v27 }
 0x253   : > { %1493 = vst.msk [vmem:[%s2520_s14 + $0x10] sm:$0xff] %vm1490_vm1, %v1416_v37  ;;  %1454 = vmatmul.bf16.gmra.mxu1 %v1326_v30 }
 0x254   : > { %v1255_v46 = vpop.f32.mrf.mxu0 }
 0x255   : > { %v1256_v39 = vadd.f32 %v2449_v10, %v1255_v46 }
 0x257   : > { %v1305_v1 = vmax.f32 %v1256_v39, 0.0 }
 0x258   : > { %v1417_v45 = vpop.f32.mrf.mxu1 }
 0x259   : > { %v1418_v38 = vadd.f32 %v2513_v28, %v1417_v45 }
 0x25b   : > { %1494 = vst.msk [vmem:[%s2520_s14 + $0x18] sm:$0xff] %vm1490_vm1, %v1418_v38 }
 0x25c   : > { %v1257_v26 = vpop.f32.mrf.mxu0 }
 0x25d   : > { %v1258_v32 = vadd.f32 %v2449_v10, %v1257_v26 }
 0x25f   : > { %v1306_v43 = vmax.f32 %v1258_v32, 0.0 }
 0x260   : > { %v1420_v48 = vpop.f32.mrf.mxu1 }
 0x261   : > { %v1327_v56 = vpack.c.bf16 %v1306_v43, %v1305_v1  ;;  %v1421_v17 = vadd.f32 %v2513_v28, %v1420_v48 }
 0x263   : > { %1495 = vst.msk [vmem:[%s2520_s14 + $0x20] sm:$0xff] %vm1490_vm1, %v1421_v17  ;;  %1459 = vmatmul.bf16.gmra.mxu1 %v1327_v56 }
 0x264   : > { %v1260_v55 = vpop.f32.mrf.mxu0 }
 0x265   : > { %v1261_v62 = vadd.f32 %v2449_v10, %v1260_v55 }
 0x267   : > { %v1307_v16 = vmax.f32 %v1261_v62, 0.0 }
 0x268   : > { %v1422_v7 = vpop.f32.mrf.mxu1 }
 0x269   : > { %v1423_v11 = vadd.f32 %v2513_v28, %v1422_v7 }
 0x26b   : > { %1496 = vst.msk [vmem:[%s2520_s14 + $0x28] sm:$0xff] %vm1490_vm1, %v1423_v11 }
 0x26c   : > { %v1262_v54 = vpop.f32.mrf.mxu0 }
 0x26d   : > { %v1263_v20 = vadd.f32 %v2449_v10, %v1262_v54 }
 0x26f   : > { %v1308_v5 = vmax.f32 %v1263_v20, 0.0 }
 0x270   : > { %v1425_v42 = vpop.f32.mrf.mxu1 }
 0x271   : > { %v1328_v24 = vpack.c.bf16 %v1308_v5, %v1307_v16  ;;  %v1426_v49 = vadd.f32 %v2513_v28, %v1425_v42 }
 0x273   : > { %1497 = vst.msk [vmem:[%s2520_s14 + $0x30] sm:$0xff] %vm1490_vm1, %v1426_v49  ;;  %1464 = vmatmul.bf16.gmra.mxu1 %v1328_v24 }
 0x274   : > { %v1265_v6 = vpop.f32.mrf.mxu0 }
 0x275   : > { %v1266_v63 = vadd.f32 %v2449_v10, %v1265_v6 }
 0x277   : > { %v1309_v23 = vmax.f32 %v1266_v63, 0.0 }
 0x278   : > { %v1427_v60 = vpop.f32.mrf.mxu1 }
 0x279   : > { %v1428_v25 = vadd.f32 %v2513_v28, %v1427_v60 }
 0x27b   : > { %1498 = vst.msk [vmem:[%s2520_s14 + $0x38] sm:$0xff] %vm1490_vm1, %v1428_v25 }
 0x27c   : > { %v1267_v51 = vpop.f32.mrf.mxu0 }
 0x27d   : > { %v1268_v12 = vadd.f32 %v2449_v10, %v1267_v51 }
 0x27f   : > { %v1310_v3 = vmax.f32 %v1268_v12, 0.0 }
 0x280   : > { %v1430_v50 = vpop.f32.mrf.mxu1 }
 0x281   : > { %v1329_v41 = vpack.c.bf16 %v1310_v3, %v1309_v23  ;;  %v1431_v34 = vadd.f32 %v2513_v28, %v1430_v50 }
 0x283   : > { %1499 = vst.msk [vmem:[%s2520_s14 + $0x40] sm:$0xff] %vm1490_vm1, %v1431_v34  ;;  %1469 = vmatmul.bf16.gmra.mxu1 %v1329_v41 }
 0x284   : > { %v1270_v47 = vpop.f32.mrf.mxu0 }
 0x285   : > { %v1271_v52 = vadd.f32 %v2449_v10, %v1270_v47 }
 0x287   : > { %v1311_v0 = vmax.f32 %v1271_v52, 0.0 }
 0x288   : > { %v1432_v58 = vpop.f32.mrf.mxu1 }
 0x289   : > { %v1433_v31 = vadd.f32 %v2513_v28, %v1432_v58 }
 0x28b   : > { %1500 = vst.msk [vmem:[%s2520_s14 + $0x48] sm:$0xff] %vm1490_vm1, %v1433_v31 }
 0x28c   : > { %v1272_v8 = vpop.f32.mrf.mxu0 }
 0x28d   : > { %v1273_v29 = vadd.f32 %v2449_v10, %v1272_v8 }
 0x28f   : > { %v1312_v21 = vmax.f32 %v1273_v29, 0.0 }
 0x290   : > { %v1435_v61 = vpop.f32.mrf.mxu1 }
 0x291   : > { %v1330_v33 = vpack.c.bf16 %v1312_v21, %v1311_v0  ;;  %v1436_v22 = vadd.f32 %v2513_v28, %v1435_v61 }
 0x293   : > { %1501 = vst.msk [vmem:[%s2520_s14 + $0x50] sm:$0xff] %vm1490_vm1, %v1436_v22  ;;  %1474 = vmatmul.bf16.gmra.mxu1 %v1330_v33 }
 0x294   : > { %v1275_v44 = vpop.f32.mrf.mxu0 }
 0x295   : > { %v1276_v2 = vadd.f32 %v2449_v10, %v1275_v44 }
 0x297   : > { %v1313_v40 = vmax.f32 %v1276_v2, 0.0 }
 0x298   : > { %v1437_v15 = vpop.f32.mrf.mxu1 }
 0x299   : > { %v1438_v35 = vadd.f32 %v2513_v28, %v1437_v15 }
 0x29b   : > { %1502 = vst.msk [vmem:[%s2520_s14 + $0x58] sm:$0xff] %vm1490_vm1, %v1438_v35 }
 0x29c   : > { %v1277_v19 = vpop.f32.mrf.mxu0 }
 0x29d   : > { %v1278_v9 = vadd.f32 %v2449_v10, %v1277_v19 }
 0x29f   : > { %v1314_v36 = vmax.f32 %v1278_v9, 0.0 }
 0x2a0   : > { %v1440_v53 = vpop.f32.mrf.mxu1 }
 0x2a1   : > { %v1331_v57 = vpack.c.bf16 %v1314_v36, %v1313_v40  ;;  %v1441_v14 = vadd.f32 %v2513_v28, %v1440_v53 }
 0x2a3   : > { %1503 = vst.msk [vmem:[%s2520_s14 + $0x60] sm:$0xff] %vm1490_vm1, %v1441_v14  ;;  %1479 = vmatmul.bf16.gmra.mxu1 %v1331_v57 }
 0x2a8   : > { %v1442_v59 = vpop.f32.mrf.mxu1 }
 0x2a9   : > { %v1443_v13 = vadd.f32 %v2513_v28, %v1442_v59 }
 0x2aa   : > { %v1280_v18 = vpop.f32.mrf.mxu2 }
 0x2ab   : > { %1504 = vst.msk [vmem:[%s2520_s14 + $0x68] sm:$0xff] %vm1490_vm1, %v1443_v13  ;;  %v1281_v4 = vadd.f32 %v2449_v10, %v1280_v18 }
 0x2ad   : > { %v1315_v45 = vmax.f32 %v1281_v4, 0.0 }
 0x2b0   : > { %v1445_v27 = vpop.f32.mrf.mxu1 }
 0x2b1   : > { %v1446_v30 = vadd.f32 %v2513_v28, %v1445_v27 }
 0x2b2   : > { %v1282_v37 = vpop.f32.mrf.mxu2 }
 0x2b3   : > { %v1283_v46 = vadd.f32 %v2449_v10, %v1282_v37  ;;  %1505 = vst.msk [vmem:[%s2520_s14 + $0x70] sm:$0xff] %vm1490_vm1, %v1446_v30 }
 0x2b5   : > { %v1316_v38 = vmax.f32 %v1283_v46, 0.0 }
 0x2b7   : > { %v1332_v39 = vpack.c.bf16 %v1316_v38, %v1315_v45 }
 0x2b8   : > { %v1447_v26 = vpop.f32.mrf.mxu1 }
 0x2b9   : > { %1484 = vmatmul.bf16.gmra.mxu1 %v1332_v39  ;;  %v1448_v32 = vadd.f32 %v2513_v28, %v1447_v26 }
 0x2bb   : > { %1506 = vst.msk [vmem:[%s2520_s14 + $0x78] sm:$0xff] %vm1490_vm1, %v1448_v32 }
 0x2c0   : > { %v1450_v1 = vpop.f32.mrf.mxu1 }
 0x2c1   : > { %v1451_v43 = vadd.f32 %v2513_v28, %v1450_v1 }
 0x2c3   : > { %1507 = vst.msk [vmem:[%s2520_s14 + $0x80] sm:$0xff] %vm1490_vm1, %v1451_v43 }
 0x2c8   : > { %v1452_v10 = vpop.f32.mrf.mxu1 }
 0x2c9   : > { %v1453_v48 = vadd.f32 %v2513_v28, %v1452_v10 }
 0x2cb   : > { %1508 = vst.msk [vmem:[%s2520_s14 + $0x88] sm:$0xff] %vm1490_vm1, %v1453_v48 }
 0x2d0   : > { %v1455_v56 = vpop.f32.mrf.mxu1 }
 0x2d1   : > { %v1456_v17 = vadd.f32 %v2513_v28, %v1455_v56 }
 0x2d3   : > { %1509 = vst.msk [vmem:[%s2520_s14 + $0x90] sm:$0xff] %vm1490_vm1, %v1456_v17 }
 0x2d8   : > { %v1457_v55 = vpop.f32.mrf.mxu1 }
 0x2d9   : > { %v1458_v7 = vadd.f32 %v2513_v28, %v1457_v55 }
 0x2db   : > { %1510 = vst.msk [vmem:[%s2520_s14 + $0x98] sm:$0xff] %vm1490_vm1, %v1458_v7 }
 0x2e0   : > { %v1460_v11 = vpop.f32.mrf.mxu1 }
 0x2e1   : > { %v1461_v62 = vadd.f32 %v2513_v28, %v1460_v11 }
 0x2e3   : > { %1511 = vst.msk [vmem:[%s2520_s14 + $0xa0] sm:$0xff] %vm1490_vm1, %v1461_v62 }
 0x2e8   : > { %v1462_v54 = vpop.f32.mrf.mxu1 }
 0x2e9   : > { %v1463_v20 = vadd.f32 %v2513_v28, %v1462_v54 }
 0x2eb   : > { %1512 = vst.msk [vmem:[%s2520_s14 + $0xa8] sm:$0xff] %vm1490_vm1, %v1463_v20 }
 0x2f0   : > { %v1465_v16 = vpop.f32.mrf.mxu1 }
 0x2f1   : > { %v1466_v5 = vadd.f32 %v2513_v28, %v1465_v16 }
 0x2f3   : > { %1513 = vst.msk [vmem:[%s2520_s14 + $0xb0] sm:$0xff] %vm1490_vm1, %v1466_v5 }
 0x2f8   : > { %v1467_v42 = vpop.f32.mrf.mxu1 }
 0x2f9   : > { %v1468_v24 = vadd.f32 %v2513_v28, %v1467_v42 }
 0x2fb   : > { %1514 = vst.msk [vmem:[%s2520_s14 + $0xb8] sm:$0xff] %vm1490_vm1, %v1468_v24 }
 0x300   : > { %v1470_v49 = vpop.f32.mrf.mxu1 }
 0x301   : > { %v1471_v6 = vadd.f32 %v2513_v28, %v1470_v49 }
 0x303   : > { %1515 = vst.msk [vmem:[%s2520_s14 + $0xc0] sm:$0xff] %vm1490_vm1, %v1471_v6 }
 0x308   : > { %v1472_v60 = vpop.f32.mrf.mxu1 }
 0x309   : > { %v1473_v25 = vadd.f32 %v2513_v28, %v1472_v60 }
 0x30b   : > { %1516 = vst.msk [vmem:[%s2520_s14 + $0xc8] sm:$0xff] %vm1490_vm1, %v1473_v25 }
 0x310   : > { %v1475_v63 = vpop.f32.mrf.mxu1 }
 0x311   : > { %v1476_v51 = vadd.f32 %v2513_v28, %v1475_v63 }
 0x313   : > { %1517 = vst.msk [vmem:[%s2520_s14 + $0xd0] sm:$0xff] %vm1490_vm1, %v1476_v51 }
 0x318   : > { %v1477_v12 = vpop.f32.mrf.mxu1 }
 0x319   : > { %v1478_v23 = vadd.f32 %v2513_v28, %v1477_v12 }
 0x31b   : > { %1518 = vst.msk [vmem:[%s2520_s14 + $0xd8] sm:$0xff] %vm1490_vm1, %v1478_v23 }
 0x320   : > { %v1480_v3 = vpop.f32.mrf.mxu1 }
 0x321   : > { %v1481_v50 = vadd.f32 %v2513_v28, %v1480_v3 }
 0x323   : > { %1519 = vst.msk [vmem:[%s2520_s14 + $0xe0] sm:$0xff] %vm1490_vm1, %v1481_v50 }
 0x328   : > { %v1482_v41 = vpop.f32.mrf.mxu1 }
 0x329   : > { %v1483_v34 = vadd.f32 %v2513_v28, %v1482_v41 }
 0x32b   : > { %1520 = vst.msk [vmem:[%s2520_s14 + $0xe8] sm:$0xff] %vm1490_vm1, %v1483_v34 }
 0x336   : > { %v1485_v47 = vpop.f32.mrf.mxu1 }
 0x337   : > { %v1486_v58 = vadd.f32 %v2513_v28, %v1485_v47 }
 0x339   : > { %1521 = vst.msk [vmem:[%s2520_s14 + $0xf0] sm:$0xff] %vm1490_vm1, %v1486_v58 }
 0x33e   : > { %v1487_v31 = vpop.f32.mrf.mxu1 }
 0x33f   : > { %v1488_v52 = vadd.f32 %v2513_v28, %v1487_v31 }
 0x341   : > { %1522 = vst.msk [vmem:[%s2520_s14 + $0xf8] sm:$0xff] %vm1490_vm1, %v1488_v52 }
 0x342 PF: > { %s19_s30 = sadd.s32 1, %s1831_s30  }
 0x343   : > { %p16_p4 = scmp.ge.s32.totalorder %s19_s30, 4  }
 0x345   :  { %18 = sbr.rel (!%p16_p4) target bundleno = 1 (0x1), region = 86 }

</bundles_post_ra>
